<compile_context>
chip_gen: v5e
topology: v5e:2x2
jax: 0.10.0
libtpu: 0.0.40
codegen_flags: <defaults>
</compile_context>

<pallas_src>
import math

import jax
import jax.numpy as jnp
from jax import lax
from jax.experimental import pallas as pl
from jax.experimental.pallas import tpu as pltpu

# ----------------------------- model config (small, synthetic) -----------------
VOCAB = 128
HIDDEN = 32
HEADS = 2
HEAD_DIM = HIDDEN // HEADS
INTERMEDIATE = 64
NUM_LAYERS = 2
MAX_SEQ = 8
NUM_CLASSES = 2
LOGIT_PAD = 128          # lane-dense classifier output slab
LN_EPS = 1e-12


# ----------------------------- in-kernel helpers --------------------------------
def _layernorm(x, g, b):
    mean = jnp.mean(x, axis=-1, keepdims=True)
    xc = x - mean
    var = jnp.mean(xc * xc, axis=-1, keepdims=True)
    return xc * lax.rsqrt(var + LN_EPS) * g + b


def _gelu(x):
    # TODO(synk): BERT uses exact erf-GELU; tanh approximation used here (EUP-friendly).
    return 0.5 * x * (1.0 + jnp.tanh(0.7978845608028654 * (x + 0.044715 * x * x * x)))


# ----------------------------- fused forward kernel -----------------------------
def _fused_bert_kernel(ids_ref, mask_ref,
                       wemb_ref, pos_ref, typ_ref, eg_ref, eb_ref,
                       wqkv_ref, bqkv_ref, wo_ref, bo_ref, ln1g_ref, ln1b_ref,
                       w1_ref, b1_ref, w2_ref, b2_ref, ln2g_ref, ln2b_ref,
                       wp_ref, bp_ref, wc_ref, bc_ref,
                       out_ref):
    """One grid step == one batch element's full BERT forward."""
    ids = ids_ref[0]                       # (S, 1) int32
    S = ids.shape[0]
    V = wemb_ref.shape[0]

    # ---- embeddings: word (one-hot gather on MXU) + position + token-type, LayerNorm
    # TODO(synk): at real vocab sizes replace the one-hot matmul with a DMA/row gather
    # of word_emb kept in HBM (pl.ANY); at VOCAB=128 the full table fits VMEM trivially.
    iota_v = lax.broadcasted_iota(jnp.int32, (S, V), 1)
    onehot = (iota_v == ids).astype(jnp.float32)                       # (S, V)
    x = jnp.dot(onehot, wemb_ref[...], preferred_element_type=jnp.float32)
    x = x + pos_ref[...] + typ_ref[...]                                # (S, H)
    x = _layernorm(x, eg_ref[...], eb_ref[...])

    # additive attention mask: 0 for attended keys, -1e9 for padding   # (1, S)
    addmask = (1.0 - mask_ref[0]) * -1e9

    scale = 1.0 / math.sqrt(HEAD_DIM)
    for l in range(NUM_LAYERS):                                        # static unroll
        # fused QKV projection: one (S, 3H) matmul instead of three (S, H) ones
        qkv = jnp.dot(x, wqkv_ref[l], preferred_element_type=jnp.float32) + bqkv_ref[l]
        q = qkv[:, 0 * HIDDEN:1 * HIDDEN]
        k = qkv[:, 1 * HIDDEN:2 * HIDDEN]
        v = qkv[:, 2 * HIDDEN:3 * HIDDEN]

        # per-head scaled dot-product attention (heads unrolled, all in VMEM)
        ctx_heads = []
        for h in range(HEADS):
            lo, hi = h * HEAD_DIM, (h + 1) * HEAD_DIM
            qh, kh, vh = q[:, lo:hi], k[:, lo:hi], v[:, lo:hi]          # (S, Dh)
            s = lax.dot_general(qh, kh, (((1,), (1,)), ((), ())),
                                preferred_element_type=jnp.float32) * scale  # (S, S)
            s = s + addmask
            m = jnp.max(s, axis=-1, keepdims=True)
            p = jnp.exp(s - m)
            lsum = jnp.sum(p, axis=-1, keepdims=True)
            attn = p * pl.reciprocal(lsum, approx=True)                 # EUP, not VALU
            ctx_heads.append(jnp.dot(attn, vh, preferred_element_type=jnp.float32))
        ctx = jnp.concatenate(ctx_heads, axis=-1)                       # (S, H)

        attn_out = jnp.dot(ctx, wo_ref[l], preferred_element_type=jnp.float32) + bo_ref[l]
        x = _layernorm(attn_out + x, ln1g_ref[l], ln1b_ref[l])

        inter = jnp.dot(x, w1_ref[l], preferred_element_type=jnp.float32) + b1_ref[l]
        inter = _gelu(inter)
        ffn = jnp.dot(inter, w2_ref[l], preferred_element_type=jnp.float32) + b2_ref[l]
        x = _layernorm(ffn + x, ln2g_ref[l], ln2b_ref[l])

    # ---- BERT pooler on the CLS token; Dropout(0.1) is identity in eval mode.
    cls = x[0:1, :]                                                     # (1, H)
    pooled = jnp.tanh(jnp.dot(cls, wp_ref[...],
                              preferred_element_type=jnp.float32) + bp_ref[...])

    # ---- classifier into a lane-dense padded slab (first NUM_CLASSES lanes are real)
    out_ref[0] = jnp.dot(pooled, wc_ref[...],
                         preferred_element_type=jnp.float32) + bc_ref[...]


# ----------------------------- parameter init (deterministic) ------------------
def init_params(key):
    def nrm(k, shape):
        return jax.random.normal(k, shape, dtype=jnp.float32) * 0.02

    keys = iter(jax.random.split(key, 16))
    L, H, I = NUM_LAYERS, HIDDEN, INTERMEDIATE

    wc = nrm(next(keys), (H, NUM_CLASSES))
    wc_pad = jnp.zeros((H, LOGIT_PAD), jnp.float32).at[:, :NUM_CLASSES].set(wc)
    bc_pad = jnp.zeros((1, LOGIT_PAD), jnp.float32)

    return {
        "word_emb": nrm(next(keys), (VOCAB, H)),
        "pos_emb": nrm(next(keys), (MAX_SEQ, H)),
        "type_emb": nrm(next(keys), (1, H)),
        "emb_ln_g": jnp.ones((1, H), jnp.float32),
        "emb_ln_b": jnp.zeros((1, H), jnp.float32),
        # per-layer weights stacked along a leading layer axis; QKV pre-fused
        "wqkv": nrm(next(keys), (L, H, 3 * H)),
        "bqkv": jnp.zeros((L, 1, 3 * H), jnp.float32),
        "wo": nrm(next(keys), (L, H, H)),
        "bo": jnp.zeros((L, 1, H), jnp.float32),
        "ln1_g": jnp.ones((L, 1, H), jnp.float32),
        "ln1_b": jnp.zeros((L, 1, H), jnp.float32),
        "w1": nrm(next(keys), (L, H, I)),
        "b1": jnp.zeros((L, 1, I), jnp.float32),
        "w2": nrm(next(keys), (L, I, H)),
        "b2": jnp.zeros((L, 1, H), jnp.float32),
        "ln2_g": jnp.ones((L, 1, H), jnp.float32),
        "ln2_b": jnp.zeros((L, 1, H), jnp.float32),
        # pooler + classifier (classifier stored lane-padded to LOGIT_PAD)
        "wp": nrm(next(keys), (H, H)),
        "bp": jnp.zeros((1, H), jnp.float32),
        "wc_pad": wc_pad,
        "bc_pad": bc_pad,
    }


# ----------------------------- forward pass --------------------------------------
def bert_sentiment_forward(params, input_ids, attention_mask):
    B, S = input_ids.shape

    # metadata-only reshapes so the kernel sees per-batch 3D blocks
    ids3 = input_ids.reshape(B, S, 1).astype(jnp.int32)
    mask3 = attention_mask.reshape(B, 1, S).astype(jnp.float32)

    weights = (
        params["word_emb"], params["pos_emb"][:S], params["type_emb"],
        params["emb_ln_g"], params["emb_ln_b"],
        params["wqkv"], params["bqkv"], params["wo"], params["bo"],
        params["ln1_g"], params["ln1_b"],
        params["w1"], params["b1"], params["w2"], params["b2"],
        params["ln2_g"], params["ln2_b"],
        params["wp"], params["bp"], params["wc_pad"], params["bc_pad"],
    )

    def _const_map(rank):
        return lambda b: (0,) * rank

    def _full_spec(arr):
        return pl.BlockSpec(arr.shape, _const_map(arr.ndim))

    in_specs = [
        pl.BlockSpec((1, S, 1), lambda b: (b, 0, 0)),      # ids, one batch row
        pl.BlockSpec((1, 1, S), lambda b: (b, 0, 0)),      # mask, one batch row
    ] + [_full_spec(w) for w in weights]                   # weights: VMEM-resident

    out = pl.pallas_call(
        _fused_bert_kernel,
        out_shape=jax.ShapeDtypeStruct((B, 1, LOGIT_PAD), jnp.float32),
        grid=(B,),
        in_specs=in_specs,
        out_specs=pl.BlockSpec((1, 1, LOGIT_PAD), lambda b: (b, 0, 0)),
        compiler_params=pltpu.CompilerParams(
            dimension_semantics=("parallel",)),            # 2x on v7x dual-TC
    )(ids3, mask3, *weights)

    return out.reshape(B, LOGIT_PAD)[:, :NUM_CLASSES]


# ----------------------------- main ----------------------------------------------
if __name__ == "__main__":
    key = jax.random.PRNGKey(0)
    k_param, k_ids = jax.random.split(key)

    params = init_params(k_param)

    B, S = 2, MAX_SEQ
    input_ids = jax.random.randint(k_ids, (B, S), 0, VOCAB, dtype=jnp.int32)
    attention_mask = jnp.array([[1, 1, 1, 1, 1, 1, 1, 1],
                                [1, 1, 1, 1, 1, 0, 0, 0]], dtype=jnp.int32)

    logits = bert_sentiment_forward(params, input_ids, attention_mask)
    logits = jax.block_until_ready(logits)
    assert logits.shape == (B, NUM_CLASSES) and logits.dtype == jnp.float32
    assert bool(jnp.all(jnp.isfinite(logits)))
    print("KERNEL_OK")
</pallas_src>

<mosaic_0001>
module attributes {stable_mosaic.version = 11 : i64} {
  func.func @_fused_bert_kernel(%arg0: i32, %arg1: memref<1x8x1xi32, #tpu.memory_space<vmem>>, %arg2: memref<1x1x8xf32, #tpu.memory_space<vmem>>, %arg3: memref<128x32xf32, #tpu.memory_space<vmem>>, %arg4: memref<8x32xf32, #tpu.memory_space<vmem>>, %arg5: memref<1x32xf32, #tpu.memory_space<vmem>>, %arg6: memref<1x32xf32, #tpu.memory_space<vmem>>, %arg7: memref<1x32xf32, #tpu.memory_space<vmem>>, %arg8: memref<2x32x96xf32, #tpu.memory_space<vmem>>, %arg9: memref<2x1x96xf32, #tpu.memory_space<vmem>>, %arg10: memref<2x32x32xf32, #tpu.memory_space<vmem>>, %arg11: memref<2x1x32xf32, #tpu.memory_space<vmem>>, %arg12: memref<2x1x32xf32, #tpu.memory_space<vmem>>, %arg13: memref<2x1x32xf32, #tpu.memory_space<vmem>>, %arg14: memref<2x32x64xf32, #tpu.memory_space<vmem>>, %arg15: memref<2x1x64xf32, #tpu.memory_space<vmem>>, %arg16: memref<2x64x32xf32, #tpu.memory_space<vmem>>, %arg17: memref<2x1x32xf32, #tpu.memory_space<vmem>>, %arg18: memref<2x1x32xf32, #tpu.memory_space<vmem>>, %arg19: memref<2x1x32xf32, #tpu.memory_space<vmem>>, %arg20: memref<32x32xf32, #tpu.memory_space<vmem>>, %arg21: memref<1x32xf32, #tpu.memory_space<vmem>>, %arg22: memref<32x128xf32, #tpu.memory_space<vmem>>, %arg23: memref<1x128xf32, #tpu.memory_space<vmem>>, %arg24: memref<1x1x128xf32, #tpu.memory_space<vmem>>) attributes {dimension_semantics = [#tpu.dimension_semantics<parallel>], iteration_bounds = array<i64: 2>, scalar_prefetch = 0 : i64, scratch_operands = 0 : i64, tpu.core_type = #tpu.core_type<tc>, window_params = [{transform_indices = @transform_0, window_bounds = array<i64: 1, 8, 1>}, {transform_indices = @transform_1, window_bounds = array<i64: 1, 1, 8>}, {pipeline_mode = #tpu.pipeline_mode<synchronous>, transform_indices = @transform_2, window_bounds = array<i64: 128, 32>}, {pipeline_mode = #tpu.pipeline_mode<synchronous>, transform_indices = @transform_3, window_bounds = array<i64: 8, 32>}, {pipeline_mode = #tpu.pipeline_mode<synchronous>, transform_indices = @transform_4, window_bounds = array<i64: 1, 32>}, {pipeline_mode = #tpu.pipeline_mode<synchronous>, transform_indices = @transform_5, window_bounds = array<i64: 1, 32>}, {pipeline_mode = #tpu.pipeline_mode<synchronous>, transform_indices = @transform_6, window_bounds = array<i64: 1, 32>}, {pipeline_mode = #tpu.pipeline_mode<synchronous>, transform_indices = @transform_7, window_bounds = array<i64: 2, 32, 96>}, {pipeline_mode = #tpu.pipeline_mode<synchronous>, transform_indices = @transform_8, window_bounds = array<i64: 2, 1, 96>}, {pipeline_mode = #tpu.pipeline_mode<synchronous>, transform_indices = @transform_9, window_bounds = array<i64: 2, 32, 32>}, {pipeline_mode = #tpu.pipeline_mode<synchronous>, transform_indices = @transform_10, window_bounds = array<i64: 2, 1, 32>}, {pipeline_mode = #tpu.pipeline_mode<synchronous>, transform_indices = @transform_11, window_bounds = array<i64: 2, 1, 32>}, {pipeline_mode = #tpu.pipeline_mode<synchronous>, transform_indices = @transform_12, window_bounds = array<i64: 2, 1, 32>}, {pipeline_mode = #tpu.pipeline_mode<synchronous>, transform_indices = @transform_13, window_bounds = array<i64: 2, 32, 64>}, {pipeline_mode = #tpu.pipeline_mode<synchronous>, transform_indices = @transform_14, window_bounds = array<i64: 2, 1, 64>}, {pipeline_mode = #tpu.pipeline_mode<synchronous>, transform_indices = @transform_15, window_bounds = array<i64: 2, 64, 32>}, {pipeline_mode = #tpu.pipeline_mode<synchronous>, transform_indices = @transform_16, window_bounds = array<i64: 2, 1, 32>}, {pipeline_mode = #tpu.pipeline_mode<synchronous>, transform_indices = @transform_17, window_bounds = array<i64: 2, 1, 32>}, {pipeline_mode = #tpu.pipeline_mode<synchronous>, transform_indices = @transform_18, window_bounds = array<i64: 2, 1, 32>}, {pipeline_mode = #tpu.pipeline_mode<synchronous>, transform_indices = @transform_19, window_bounds = array<i64: 32, 32>}, {pipeline_mode = #tpu.pipeline_mode<synchronous>, transform_indices = @transform_20, window_bounds = array<i64: 1, 32>}, {pipeline_mode = #tpu.pipeline_mode<synchronous>, transform_indices = @transform_21, window_bounds = array<i64: 32, 128>}, {pipeline_mode = #tpu.pipeline_mode<synchronous>, transform_indices = @transform_22, window_bounds = array<i64: 1, 128>}, {transform_indices = @transform_23, window_bounds = array<i64: 1, 1, 128>}]} {
    %c0 = arith.constant 0 : index
    %c0_0 = arith.constant 0 : index
    %c0_1 = arith.constant 0 : index
    %0 = vector.load %arg1[%c0, %c0_0, %c0_1] : memref<1x8x1xi32, #tpu.memory_space<vmem>>, vector<1x8x1xi32>
    %1 = vector.shape_cast %0 : vector<1x8x1xi32> to vector<8x1xi32>
    %2 = tpu.iota {dimensions = array<i32: 1>} : vector<8x128xi32>
    %3 = vector.broadcast %1 : vector<8x1xi32> to vector<8x128xi32>
    %4 = arith.cmpi eq, %2, %3 : vector<8x128xi32>
    %5 = arith.extui %4 : vector<8x128xi1> to vector<8x128xi32>
    %6 = arith.sitofp %5 : vector<8x128xi32> to vector<8x128xf32>
    %c0_2 = arith.constant 0 : index
    %c0_3 = arith.constant 0 : index
    %7 = vector.load %arg3[%c0_2, %c0_3] : memref<128x32xf32, #tpu.memory_space<vmem>>, vector<128x32xf32>
    %cst = arith.constant dense<0.000000e+00> : vector<8x32xf32>
    %8 = tpu.matmul %6, %7, %cst {dimension_numbers = #tpu.dot_dimension_numbers<[1], [0], [0], [1], [0, 0, 1, 1], [], []>} : vector<8x128xf32>, vector<128x32xf32>, vector<8x32xf32> -> vector<8x32xf32>
    %c0_4 = arith.constant 0 : index
    %c0_5 = arith.constant 0 : index
    %9 = vector.load %arg4[%c0_4, %c0_5] : memref<8x32xf32, #tpu.memory_space<vmem>>, vector<8x32xf32>
    %10 = arith.addf %8, %9 : vector<8x32xf32>
    %c0_6 = arith.constant 0 : index
    %c0_7 = arith.constant 0 : index
    %11 = vector.load %arg5[%c0_6, %c0_7] : memref<1x32xf32, #tpu.memory_space<vmem>>, vector<1x32xf32>
    %12 = vector.broadcast %11 : vector<1x32xf32> to vector<8x32xf32>
    %13 = arith.addf %10, %12 : vector<8x32xf32>
    %c0_8 = arith.constant 0 : index
    %c0_9 = arith.constant 0 : index
    %14 = vector.load %arg6[%c0_8, %c0_9] : memref<1x32xf32, #tpu.memory_space<vmem>>, vector<1x32xf32>
    %c0_10 = arith.constant 0 : index
    %c0_11 = arith.constant 0 : index
    %15 = vector.load %arg7[%c0_10, %c0_11] : memref<1x32xf32, #tpu.memory_space<vmem>>, vector<1x32xf32>
    %cst_12 = arith.constant dense<0.000000e+00> : vector<8xf32>
    %16 = vector.multi_reduction <add>, %13, %cst_12 [1] : vector<8x32xf32> to vector<8xf32>
    %17 = vector.shape_cast %16 : vector<8xf32> to vector<8x1xf32>
    %cst_13 = arith.constant 3.200000e+01 : f32
    %18 = vector.broadcast %cst_13 : f32 to vector<8x1xf32>
    %19 = arith.divf %17, %18 : vector<8x1xf32>
    %20 = vector.broadcast %19 : vector<8x1xf32> to vector<8x32xf32>
    %21 = arith.subf %13, %20 : vector<8x32xf32>
    %22 = arith.mulf %21, %21 : vector<8x32xf32>
    %cst_14 = arith.constant dense<0.000000e+00> : vector<8xf32>
    %23 = vector.multi_reduction <add>, %22, %cst_14 [1] : vector<8x32xf32> to vector<8xf32>
    %24 = vector.shape_cast %23 : vector<8xf32> to vector<8x1xf32>
    %cst_15 = arith.constant 3.200000e+01 : f32
    %25 = vector.broadcast %cst_15 : f32 to vector<8x1xf32>
    %26 = arith.divf %24, %25 : vector<8x1xf32>
    %cst_16 = arith.constant 9.99999996E-13 : f32
    %27 = vector.broadcast %cst_16 : f32 to vector<8x1xf32>
    %28 = arith.addf %26, %27 : vector<8x1xf32>
    %29 = math.rsqrt %28 : vector<8x1xf32>
    %30 = vector.broadcast %29 : vector<8x1xf32> to vector<8x32xf32>
    %31 = arith.mulf %21, %30 : vector<8x32xf32>
    %32 = vector.broadcast %14 : vector<1x32xf32> to vector<8x32xf32>
    %33 = arith.mulf %31, %32 : vector<8x32xf32>
    %34 = vector.broadcast %15 : vector<1x32xf32> to vector<8x32xf32>
    %35 = arith.addf %33, %34 : vector<8x32xf32>
    %c0_17 = arith.constant 0 : index
    %c0_18 = arith.constant 0 : index
    %c0_19 = arith.constant 0 : index
    %36 = vector.load %arg2[%c0_17, %c0_18, %c0_19] : memref<1x1x8xf32, #tpu.memory_space<vmem>>, vector<1x1x8xf32>
    %37 = vector.shape_cast %36 : vector<1x1x8xf32> to vector<1x8xf32>
    %cst_20 = arith.constant 1.000000e+00 : f32
    %38 = vector.broadcast %cst_20 : f32 to vector<1x8xf32>
    %39 = arith.subf %38, %37 : vector<1x8xf32>
    %cst_21 = arith.constant -1.000000e+09 : f32
    %40 = vector.broadcast %cst_21 : f32 to vector<1x8xf32>
    %41 = arith.mulf %39, %40 : vector<1x8xf32>
    %c0_22 = arith.constant 0 : index
    %c0_23 = arith.constant 0 : index
    %c0_24 = arith.constant 0 : index
    %42 = vector.load %arg8[%c0_22, %c0_23, %c0_24] : memref<2x32x96xf32, #tpu.memory_space<vmem>>, vector<1x32x96xf32>
    %43 = vector.shape_cast %42 : vector<1x32x96xf32> to vector<32x96xf32>
    %cst_25 = arith.constant dense<0.000000e+00> : vector<8x96xf32>
    %44 = tpu.matmul %35, %43, %cst_25 {dimension_numbers = #tpu.dot_dimension_numbers<[1], [0], [0], [1], [0, 0, 1, 1], [], []>} : vector<8x32xf32>, vector<32x96xf32>, vector<8x96xf32> -> vector<8x96xf32>
    %c0_26 = arith.constant 0 : index
    %c0_27 = arith.constant 0 : index
    %c0_28 = arith.constant 0 : index
    %45 = vector.load %arg9[%c0_26, %c0_27, %c0_28] : memref<2x1x96xf32, #tpu.memory_space<vmem>>, vector<1x1x96xf32>
    %46 = vector.shape_cast %45 : vector<1x1x96xf32> to vector<1x96xf32>
    %47 = vector.broadcast %46 : vector<1x96xf32> to vector<8x96xf32>
    %48 = arith.addf %44, %47 : vector<8x96xf32>
    %49 = vector.extract_strided_slice %48 {offsets = [0, 0], sizes = [8, 32], strides = [1, 1]} : vector<8x96xf32> to vector<8x32xf32>
    %50 = vector.extract_strided_slice %48 {offsets = [0, 32], sizes = [8, 32], strides = [1, 1]} : vector<8x96xf32> to vector<8x32xf32>
    %51 = vector.extract_strided_slice %48 {offsets = [0, 64], sizes = [8, 32], strides = [1, 1]} : vector<8x96xf32> to vector<8x32xf32>
    %52 = vector.extract_strided_slice %49 {offsets = [0, 0], sizes = [8, 16], strides = [1, 1]} : vector<8x32xf32> to vector<8x16xf32>
    %53 = vector.extract_strided_slice %50 {offsets = [0, 0], sizes = [8, 16], strides = [1, 1]} : vector<8x32xf32> to vector<8x16xf32>
    %54 = vector.extract_strided_slice %51 {offsets = [0, 0], sizes = [8, 16], strides = [1, 1]} : vector<8x32xf32> to vector<8x16xf32>
    %cst_29 = arith.constant dense<0.000000e+00> : vector<8x8xf32>
    %55 = tpu.matmul %52, %53, %cst_29 {dimension_numbers = #tpu.dot_dimension_numbers<[1], [1], [0], [0], [0, 0, 1, 0], [], []>} : vector<8x16xf32>, vector<8x16xf32>, vector<8x8xf32> -> vector<8x8xf32>
    %cst_30 = arith.constant 2.500000e-01 : f32
    %56 = vector.broadcast %cst_30 : f32 to vector<8x8xf32>
    %57 = arith.mulf %55, %56 : vector<8x8xf32>
    %58 = vector.broadcast %41 : vector<1x8xf32> to vector<8x8xf32>
    %59 = arith.addf %57, %58 : vector<8x8xf32>
    %cst_31 = arith.constant dense<0xFF800000> : vector<8xf32>
    %60 = vector.multi_reduction <maximumf>, %59, %cst_31 [1] : vector<8x8xf32> to vector<8xf32>
    %61 = vector.shape_cast %60 : vector<8xf32> to vector<8x1xf32>
    %62 = vector.broadcast %61 : vector<8x1xf32> to vector<8x8xf32>
    %63 = arith.subf %59, %62 : vector<8x8xf32>
    %64 = math.exp %63 : vector<8x8xf32>
    %cst_32 = arith.constant dense<0.000000e+00> : vector<8xf32>
    %65 = vector.multi_reduction <add>, %64, %cst_32 [1] : vector<8x8xf32> to vector<8xf32>
    %66 = vector.shape_cast %65 : vector<8xf32> to vector<8x1xf32>
    %67 = tpu.reciprocal %66 {approx = true} : vector<8x1xf32> -> vector<8x1xf32>
    %68 = vector.broadcast %67 : vector<8x1xf32> to vector<8x8xf32>
    %69 = arith.mulf %64, %68 : vector<8x8xf32>
    %cst_33 = arith.constant dense<0.000000e+00> : vector<8x16xf32>
    %70 = tpu.matmul %69, %54, %cst_33 {dimension_numbers = #tpu.dot_dimension_numbers<[1], [0], [0], [1], [0, 0, 1, 1], [], []>} : vector<8x8xf32>, vector<8x16xf32>, vector<8x16xf32> -> vector<8x16xf32>
    %71 = vector.extract_strided_slice %49 {offsets = [0, 16], sizes = [8, 16], strides = [1, 1]} : vector<8x32xf32> to vector<8x16xf32>
    %72 = vector.extract_strided_slice %50 {offsets = [0, 16], sizes = [8, 16], strides = [1, 1]} : vector<8x32xf32> to vector<8x16xf32>
    %73 = vector.extract_strided_slice %51 {offsets = [0, 16], sizes = [8, 16], strides = [1, 1]} : vector<8x32xf32> to vector<8x16xf32>
    %cst_34 = arith.constant dense<0.000000e+00> : vector<8x8xf32>
    %74 = tpu.matmul %71, %72, %cst_34 {dimension_numbers = #tpu.dot_dimension_numbers<[1], [1], [0], [0], [0, 0, 1, 0], [], []>} : vector<8x16xf32>, vector<8x16xf32>, vector<8x8xf32> -> vector<8x8xf32>
    %cst_35 = arith.constant 2.500000e-01 : f32
    %75 = vector.broadcast %cst_35 : f32 to vector<8x8xf32>
    %76 = arith.mulf %74, %75 : vector<8x8xf32>
    %77 = vector.broadcast %41 : vector<1x8xf32> to vector<8x8xf32>
    %78 = arith.addf %76, %77 : vector<8x8xf32>
    %cst_36 = arith.constant dense<0xFF800000> : vector<8xf32>
    %79 = vector.multi_reduction <maximumf>, %78, %cst_36 [1] : vector<8x8xf32> to vector<8xf32>
    %80 = vector.shape_cast %79 : vector<8xf32> to vector<8x1xf32>
    %81 = vector.broadcast %80 : vector<8x1xf32> to vector<8x8xf32>
    %82 = arith.subf %78, %81 : vector<8x8xf32>
    %83 = math.exp %82 : vector<8x8xf32>
    %cst_37 = arith.constant dense<0.000000e+00> : vector<8xf32>
    %84 = vector.multi_reduction <add>, %83, %cst_37 [1] : vector<8x8xf32> to vector<8xf32>
    %85 = vector.shape_cast %84 : vector<8xf32> to vector<8x1xf32>
    %86 = tpu.reciprocal %85 {approx = true} : vector<8x1xf32> -> vector<8x1xf32>
    %87 = vector.broadcast %86 : vector<8x1xf32> to vector<8x8xf32>
    %88 = arith.mulf %83, %87 : vector<8x8xf32>
    %cst_38 = arith.constant dense<0.000000e+00> : vector<8x16xf32>
    %89 = tpu.matmul %88, %73, %cst_38 {dimension_numbers = #tpu.dot_dimension_numbers<[1], [0], [0], [1], [0, 0, 1, 1], [], []>} : vector<8x8xf32>, vector<8x16xf32>, vector<8x16xf32> -> vector<8x16xf32>
    %90 = tpu.concatenate %70, %89 in 1 : vector<8x16xf32>, vector<8x16xf32> -> vector<8x32xf32>
    %c0_39 = arith.constant 0 : index
    %c0_40 = arith.constant 0 : index
    %c0_41 = arith.constant 0 : index
    %91 = vector.load %arg10[%c0_39, %c0_40, %c0_41] : memref<2x32x32xf32, #tpu.memory_space<vmem>>, vector<1x32x32xf32>
    %92 = vector.shape_cast %91 : vector<1x32x32xf32> to vector<32x32xf32>
    %cst_42 = arith.constant dense<0.000000e+00> : vector<8x32xf32>
    %93 = tpu.matmul %90, %92, %cst_42 {dimension_numbers = #tpu.dot_dimension_numbers<[1], [0], [0], [1], [0, 0, 1, 1], [], []>} : vector<8x32xf32>, vector<32x32xf32>, vector<8x32xf32> -> vector<8x32xf32>
    %c0_43 = arith.constant 0 : index
    %c0_44 = arith.constant 0 : index
    %c0_45 = arith.constant 0 : index
    %94 = vector.load %arg11[%c0_43, %c0_44, %c0_45] : memref<2x1x32xf32, #tpu.memory_space<vmem>>, vector<1x1x32xf32>
    %95 = vector.shape_cast %94 : vector<1x1x32xf32> to vector<1x32xf32>
    %96 = vector.broadcast %95 : vector<1x32xf32> to vector<8x32xf32>
    %97 = arith.addf %93, %96 : vector<8x32xf32>
    %98 = arith.addf %97, %35 : vector<8x32xf32>
    %c0_46 = arith.constant 0 : index
    %c0_47 = arith.constant 0 : index
    %c0_48 = arith.constant 0 : index
    %99 = vector.load %arg12[%c0_46, %c0_47, %c0_48] : memref<2x1x32xf32, #tpu.memory_space<vmem>>, vector<1x1x32xf32>
    %100 = vector.shape_cast %99 : vector<1x1x32xf32> to vector<1x32xf32>
    %c0_49 = arith.constant 0 : index
    %c0_50 = arith.constant 0 : index
    %c0_51 = arith.constant 0 : index
    %101 = vector.load %arg13[%c0_49, %c0_50, %c0_51] : memref<2x1x32xf32, #tpu.memory_space<vmem>>, vector<1x1x32xf32>
    %102 = vector.shape_cast %101 : vector<1x1x32xf32> to vector<1x32xf32>
    %cst_52 = arith.constant dense<0.000000e+00> : vector<8xf32>
    %103 = vector.multi_reduction <add>, %98, %cst_52 [1] : vector<8x32xf32> to vector<8xf32>
    %104 = vector.shape_cast %103 : vector<8xf32> to vector<8x1xf32>
    %cst_53 = arith.constant 3.200000e+01 : f32
    %105 = vector.broadcast %cst_53 : f32 to vector<8x1xf32>
    %106 = arith.divf %104, %105 : vector<8x1xf32>
    %107 = vector.broadcast %106 : vector<8x1xf32> to vector<8x32xf32>
    %108 = arith.subf %98, %107 : vector<8x32xf32>
    %109 = arith.mulf %108, %108 : vector<8x32xf32>
    %cst_54 = arith.constant dense<0.000000e+00> : vector<8xf32>
    %110 = vector.multi_reduction <add>, %109, %cst_54 [1] : vector<8x32xf32> to vector<8xf32>
    %111 = vector.shape_cast %110 : vector<8xf32> to vector<8x1xf32>
    %cst_55 = arith.constant 3.200000e+01 : f32
    %112 = vector.broadcast %cst_55 : f32 to vector<8x1xf32>
    %113 = arith.divf %111, %112 : vector<8x1xf32>
    %cst_56 = arith.constant 9.99999996E-13 : f32
    %114 = vector.broadcast %cst_56 : f32 to vector<8x1xf32>
    %115 = arith.addf %113, %114 : vector<8x1xf32>
    %116 = math.rsqrt %115 : vector<8x1xf32>
    %117 = vector.broadcast %116 : vector<8x1xf32> to vector<8x32xf32>
    %118 = arith.mulf %108, %117 : vector<8x32xf32>
    %119 = vector.broadcast %100 : vector<1x32xf32> to vector<8x32xf32>
    %120 = arith.mulf %118, %119 : vector<8x32xf32>
    %121 = vector.broadcast %102 : vector<1x32xf32> to vector<8x32xf32>
    %122 = arith.addf %120, %121 : vector<8x32xf32>
    %c0_57 = arith.constant 0 : index
    %c0_58 = arith.constant 0 : index
    %c0_59 = arith.constant 0 : index
    %123 = vector.load %arg14[%c0_57, %c0_58, %c0_59] : memref<2x32x64xf32, #tpu.memory_space<vmem>>, vector<1x32x64xf32>
    %124 = vector.shape_cast %123 : vector<1x32x64xf32> to vector<32x64xf32>
    %cst_60 = arith.constant dense<0.000000e+00> : vector<8x64xf32>
    %125 = tpu.matmul %122, %124, %cst_60 {dimension_numbers = #tpu.dot_dimension_numbers<[1], [0], [0], [1], [0, 0, 1, 1], [], []>} : vector<8x32xf32>, vector<32x64xf32>, vector<8x64xf32> -> vector<8x64xf32>
    %c0_61 = arith.constant 0 : index
    %c0_62 = arith.constant 0 : index
    %c0_63 = arith.constant 0 : index
    %126 = vector.load %arg15[%c0_61, %c0_62, %c0_63] : memref<2x1x64xf32, #tpu.memory_space<vmem>>, vector<1x1x64xf32>
    %127 = vector.shape_cast %126 : vector<1x1x64xf32> to vector<1x64xf32>
    %128 = vector.broadcast %127 : vector<1x64xf32> to vector<8x64xf32>
    %129 = arith.addf %125, %128 : vector<8x64xf32>
    %cst_64 = arith.constant 5.000000e-01 : f32
    %130 = vector.broadcast %cst_64 : f32 to vector<8x64xf32>
    %131 = arith.mulf %130, %129 : vector<8x64xf32>
    %cst_65 = arith.constant 4.471500e-02 : f32
    %132 = vector.broadcast %cst_65 : f32 to vector<8x64xf32>
    %133 = arith.mulf %132, %129 : vector<8x64xf32>
    %134 = arith.mulf %133, %129 : vector<8x64xf32>
    %135 = arith.mulf %134, %129 : vector<8x64xf32>
    %136 = arith.addf %129, %135 : vector<8x64xf32>
    %cst_66 = arith.constant 0.797884583 : f32
    %137 = vector.broadcast %cst_66 : f32 to vector<8x64xf32>
    %138 = arith.mulf %137, %136 : vector<8x64xf32>
    %139 = math.tanh %138 : vector<8x64xf32>
    %cst_67 = arith.constant 1.000000e+00 : f32
    %140 = vector.broadcast %cst_67 : f32 to vector<8x64xf32>
    %141 = arith.addf %140, %139 : vector<8x64xf32>
    %142 = arith.mulf %131, %141 : vector<8x64xf32>
    %c0_68 = arith.constant 0 : index
    %c0_69 = arith.constant 0 : index
    %c0_70 = arith.constant 0 : index
    %143 = vector.load %arg16[%c0_68, %c0_69, %c0_70] : memref<2x64x32xf32, #tpu.memory_space<vmem>>, vector<1x64x32xf32>
    %144 = vector.shape_cast %143 : vector<1x64x32xf32> to vector<64x32xf32>
    %cst_71 = arith.constant dense<0.000000e+00> : vector<8x32xf32>
    %145 = tpu.matmul %142, %144, %cst_71 {dimension_numbers = #tpu.dot_dimension_numbers<[1], [0], [0], [1], [0, 0, 1, 1], [], []>} : vector<8x64xf32>, vector<64x32xf32>, vector<8x32xf32> -> vector<8x32xf32>
    %c0_72 = arith.constant 0 : index
    %c0_73 = arith.constant 0 : index
    %c0_74 = arith.constant 0 : index
    %146 = vector.load %arg17[%c0_72, %c0_73, %c0_74] : memref<2x1x32xf32, #tpu.memory_space<vmem>>, vector<1x1x32xf32>
    %147 = vector.shape_cast %146 : vector<1x1x32xf32> to vector<1x32xf32>
    %148 = vector.broadcast %147 : vector<1x32xf32> to vector<8x32xf32>
    %149 = arith.addf %145, %148 : vector<8x32xf32>
    %150 = arith.addf %149, %122 : vector<8x32xf32>
    %c0_75 = arith.constant 0 : index
    %c0_76 = arith.constant 0 : index
    %c0_77 = arith.constant 0 : index
    %151 = vector.load %arg18[%c0_75, %c0_76, %c0_77] : memref<2x1x32xf32, #tpu.memory_space<vmem>>, vector<1x1x32xf32>
    %152 = vector.shape_cast %151 : vector<1x1x32xf32> to vector<1x32xf32>
    %c0_78 = arith.constant 0 : index
    %c0_79 = arith.constant 0 : index
    %c0_80 = arith.constant 0 : index
    %153 = vector.load %arg19[%c0_78, %c0_79, %c0_80] : memref<2x1x32xf32, #tpu.memory_space<vmem>>, vector<1x1x32xf32>
    %154 = vector.shape_cast %153 : vector<1x1x32xf32> to vector<1x32xf32>
    %cst_81 = arith.constant dense<0.000000e+00> : vector<8xf32>
    %155 = vector.multi_reduction <add>, %150, %cst_81 [1] : vector<8x32xf32> to vector<8xf32>
    %156 = vector.shape_cast %155 : vector<8xf32> to vector<8x1xf32>
    %cst_82 = arith.constant 3.200000e+01 : f32
    %157 = vector.broadcast %cst_82 : f32 to vector<8x1xf32>
    %158 = arith.divf %156, %157 : vector<8x1xf32>
    %159 = vector.broadcast %158 : vector<8x1xf32> to vector<8x32xf32>
    %160 = arith.subf %150, %159 : vector<8x32xf32>
    %161 = arith.mulf %160, %160 : vector<8x32xf32>
    %cst_83 = arith.constant dense<0.000000e+00> : vector<8xf32>
    %162 = vector.multi_reduction <add>, %161, %cst_83 [1] : vector<8x32xf32> to vector<8xf32>
    %163 = vector.shape_cast %162 : vector<8xf32> to vector<8x1xf32>
    %cst_84 = arith.constant 3.200000e+01 : f32
    %164 = vector.broadcast %cst_84 : f32 to vector<8x1xf32>
    %165 = arith.divf %163, %164 : vector<8x1xf32>
    %cst_85 = arith.constant 9.99999996E-13 : f32
    %166 = vector.broadcast %cst_85 : f32 to vector<8x1xf32>
    %167 = arith.addf %165, %166 : vector<8x1xf32>
    %168 = math.rsqrt %167 : vector<8x1xf32>
    %169 = vector.broadcast %168 : vector<8x1xf32> to vector<8x32xf32>
    %170 = arith.mulf %160, %169 : vector<8x32xf32>
    %171 = vector.broadcast %152 : vector<1x32xf32> to vector<8x32xf32>
    %172 = arith.mulf %170, %171 : vector<8x32xf32>
    %173 = vector.broadcast %154 : vector<1x32xf32> to vector<8x32xf32>
    %174 = arith.addf %172, %173 : vector<8x32xf32>
    %c1 = arith.constant 1 : index
    %c0_86 = arith.constant 0 : index
    %c0_87 = arith.constant 0 : index
    %175 = vector.load %arg8[%c1, %c0_86, %c0_87] : memref<2x32x96xf32, #tpu.memory_space<vmem>>, vector<1x32x96xf32>
    %176 = vector.shape_cast %175 : vector<1x32x96xf32> to vector<32x96xf32>
    %cst_88 = arith.constant dense<0.000000e+00> : vector<8x96xf32>
    %177 = tpu.matmul %174, %176, %cst_88 {dimension_numbers = #tpu.dot_dimension_numbers<[1], [0], [0], [1], [0, 0, 1, 1], [], []>} : vector<8x32xf32>, vector<32x96xf32>, vector<8x96xf32> -> vector<8x96xf32>
    %c1_89 = arith.constant 1 : index
    %c0_90 = arith.constant 0 : index
    %c0_91 = arith.constant 0 : index
    %178 = vector.load %arg9[%c1_89, %c0_90, %c0_91] : memref<2x1x96xf32, #tpu.memory_space<vmem>>, vector<1x1x96xf32>
    %179 = vector.shape_cast %178 : vector<1x1x96xf32> to vector<1x96xf32>
    %180 = vector.broadcast %179 : vector<1x96xf32> to vector<8x96xf32>
    %181 = arith.addf %177, %180 : vector<8x96xf32>
    %182 = vector.extract_strided_slice %181 {offsets = [0, 0], sizes = [8, 32], strides = [1, 1]} : vector<8x96xf32> to vector<8x32xf32>
    %183 = vector.extract_strided_slice %181 {offsets = [0, 32], sizes = [8, 32], strides = [1, 1]} : vector<8x96xf32> to vector<8x32xf32>
    %184 = vector.extract_strided_slice %181 {offsets = [0, 64], sizes = [8, 32], strides = [1, 1]} : vector<8x96xf32> to vector<8x32xf32>
    %185 = vector.extract_strided_slice %182 {offsets = [0, 0], sizes = [8, 16], strides = [1, 1]} : vector<8x32xf32> to vector<8x16xf32>
    %186 = vector.extract_strided_slice %183 {offsets = [0, 0], sizes = [8, 16], strides = [1, 1]} : vector<8x32xf32> to vector<8x16xf32>
    %187 = vector.extract_strided_slice %184 {offsets = [0, 0], sizes = [8, 16], strides = [1, 1]} : vector<8x32xf32> to vector<8x16xf32>
    %cst_92 = arith.constant dense<0.000000e+00> : vector<8x8xf32>
    %188 = tpu.matmul %185, %186, %cst_92 {dimension_numbers = #tpu.dot_dimension_numbers<[1], [1], [0], [0], [0, 0, 1, 0], [], []>} : vector<8x16xf32>, vector<8x16xf32>, vector<8x8xf32> -> vector<8x8xf32>
    %cst_93 = arith.constant 2.500000e-01 : f32
    %189 = vector.broadcast %cst_93 : f32 to vector<8x8xf32>
    %190 = arith.mulf %188, %189 : vector<8x8xf32>
    %191 = vector.broadcast %41 : vector<1x8xf32> to vector<8x8xf32>
    %192 = arith.addf %190, %191 : vector<8x8xf32>
    %cst_94 = arith.constant dense<0xFF800000> : vector<8xf32>
    %193 = vector.multi_reduction <maximumf>, %192, %cst_94 [1] : vector<8x8xf32> to vector<8xf32>
    %194 = vector.shape_cast %193 : vector<8xf32> to vector<8x1xf32>
    %195 = vector.broadcast %194 : vector<8x1xf32> to vector<8x8xf32>
    %196 = arith.subf %192, %195 : vector<8x8xf32>
    %197 = math.exp %196 : vector<8x8xf32>
    %cst_95 = arith.constant dense<0.000000e+00> : vector<8xf32>
    %198 = vector.multi_reduction <add>, %197, %cst_95 [1] : vector<8x8xf32> to vector<8xf32>
    %199 = vector.shape_cast %198 : vector<8xf32> to vector<8x1xf32>
    %200 = tpu.reciprocal %199 {approx = true} : vector<8x1xf32> -> vector<8x1xf32>
    %201 = vector.broadcast %200 : vector<8x1xf32> to vector<8x8xf32>
    %202 = arith.mulf %197, %201 : vector<8x8xf32>
    %cst_96 = arith.constant dense<0.000000e+00> : vector<8x16xf32>
    %203 = tpu.matmul %202, %187, %cst_96 {dimension_numbers = #tpu.dot_dimension_numbers<[1], [0], [0], [1], [0, 0, 1, 1], [], []>} : vector<8x8xf32>, vector<8x16xf32>, vector<8x16xf32> -> vector<8x16xf32>
    %204 = vector.extract_strided_slice %182 {offsets = [0, 16], sizes = [8, 16], strides = [1, 1]} : vector<8x32xf32> to vector<8x16xf32>
    %205 = vector.extract_strided_slice %183 {offsets = [0, 16], sizes = [8, 16], strides = [1, 1]} : vector<8x32xf32> to vector<8x16xf32>
    %206 = vector.extract_strided_slice %184 {offsets = [0, 16], sizes = [8, 16], strides = [1, 1]} : vector<8x32xf32> to vector<8x16xf32>
    %cst_97 = arith.constant dense<0.000000e+00> : vector<8x8xf32>
    %207 = tpu.matmul %204, %205, %cst_97 {dimension_numbers = #tpu.dot_dimension_numbers<[1], [1], [0], [0], [0, 0, 1, 0], [], []>} : vector<8x16xf32>, vector<8x16xf32>, vector<8x8xf32> -> vector<8x8xf32>
    %cst_98 = arith.constant 2.500000e-01 : f32
    %208 = vector.broadcast %cst_98 : f32 to vector<8x8xf32>
    %209 = arith.mulf %207, %208 : vector<8x8xf32>
    %210 = vector.broadcast %41 : vector<1x8xf32> to vector<8x8xf32>
    %211 = arith.addf %209, %210 : vector<8x8xf32>
    %cst_99 = arith.constant dense<0xFF800000> : vector<8xf32>
    %212 = vector.multi_reduction <maximumf>, %211, %cst_99 [1] : vector<8x8xf32> to vector<8xf32>
    %213 = vector.shape_cast %212 : vector<8xf32> to vector<8x1xf32>
    %214 = vector.broadcast %213 : vector<8x1xf32> to vector<8x8xf32>
    %215 = arith.subf %211, %214 : vector<8x8xf32>
    %216 = math.exp %215 : vector<8x8xf32>
    %cst_100 = arith.constant dense<0.000000e+00> : vector<8xf32>
    %217 = vector.multi_reduction <add>, %216, %cst_100 [1] : vector<8x8xf32> to vector<8xf32>
    %218 = vector.shape_cast %217 : vector<8xf32> to vector<8x1xf32>
    %219 = tpu.reciprocal %218 {approx = true} : vector<8x1xf32> -> vector<8x1xf32>
    %220 = vector.broadcast %219 : vector<8x1xf32> to vector<8x8xf32>
    %221 = arith.mulf %216, %220 : vector<8x8xf32>
    %cst_101 = arith.constant dense<0.000000e+00> : vector<8x16xf32>
    %222 = tpu.matmul %221, %206, %cst_101 {dimension_numbers = #tpu.dot_dimension_numbers<[1], [0], [0], [1], [0, 0, 1, 1], [], []>} : vector<8x8xf32>, vector<8x16xf32>, vector<8x16xf32> -> vector<8x16xf32>
    %223 = tpu.concatenate %203, %222 in 1 : vector<8x16xf32>, vector<8x16xf32> -> vector<8x32xf32>
    %c1_102 = arith.constant 1 : index
    %c0_103 = arith.constant 0 : index
    %c0_104 = arith.constant 0 : index
    %224 = vector.load %arg10[%c1_102, %c0_103, %c0_104] : memref<2x32x32xf32, #tpu.memory_space<vmem>>, vector<1x32x32xf32>
    %225 = vector.shape_cast %224 : vector<1x32x32xf32> to vector<32x32xf32>
    %cst_105 = arith.constant dense<0.000000e+00> : vector<8x32xf32>
    %226 = tpu.matmul %223, %225, %cst_105 {dimension_numbers = #tpu.dot_dimension_numbers<[1], [0], [0], [1], [0, 0, 1, 1], [], []>} : vector<8x32xf32>, vector<32x32xf32>, vector<8x32xf32> -> vector<8x32xf32>
    %c1_106 = arith.constant 1 : index
    %c0_107 = arith.constant 0 : index
    %c0_108 = arith.constant 0 : index
    %227 = vector.load %arg11[%c1_106, %c0_107, %c0_108] : memref<2x1x32xf32, #tpu.memory_space<vmem>>, vector<1x1x32xf32>
    %228 = vector.shape_cast %227 : vector<1x1x32xf32> to vector<1x32xf32>
    %229 = vector.broadcast %228 : vector<1x32xf32> to vector<8x32xf32>
    %230 = arith.addf %226, %229 : vector<8x32xf32>
    %231 = arith.addf %230, %174 : vector<8x32xf32>
    %c1_109 = arith.constant 1 : index
    %c0_110 = arith.constant 0 : index
    %c0_111 = arith.constant 0 : index
    %232 = vector.load %arg12[%c1_109, %c0_110, %c0_111] : memref<2x1x32xf32, #tpu.memory_space<vmem>>, vector<1x1x32xf32>
    %233 = vector.shape_cast %232 : vector<1x1x32xf32> to vector<1x32xf32>
    %c1_112 = arith.constant 1 : index
    %c0_113 = arith.constant 0 : index
    %c0_114 = arith.constant 0 : index
    %234 = vector.load %arg13[%c1_112, %c0_113, %c0_114] : memref<2x1x32xf32, #tpu.memory_space<vmem>>, vector<1x1x32xf32>
    %235 = vector.shape_cast %234 : vector<1x1x32xf32> to vector<1x32xf32>
    %cst_115 = arith.constant dense<0.000000e+00> : vector<8xf32>
    %236 = vector.multi_reduction <add>, %231, %cst_115 [1] : vector<8x32xf32> to vector<8xf32>
    %237 = vector.shape_cast %236 : vector<8xf32> to vector<8x1xf32>
    %cst_116 = arith.constant 3.200000e+01 : f32
    %238 = vector.broadcast %cst_116 : f32 to vector<8x1xf32>
    %239 = arith.divf %237, %238 : vector<8x1xf32>
    %240 = vector.broadcast %239 : vector<8x1xf32> to vector<8x32xf32>
    %241 = arith.subf %231, %240 : vector<8x32xf32>
    %242 = arith.mulf %241, %241 : vector<8x32xf32>
    %cst_117 = arith.constant dense<0.000000e+00> : vector<8xf32>
    %243 = vector.multi_reduction <add>, %242, %cst_117 [1] : vector<8x32xf32> to vector<8xf32>
    %244 = vector.shape_cast %243 : vector<8xf32> to vector<8x1xf32>
    %cst_118 = arith.constant 3.200000e+01 : f32
    %245 = vector.broadcast %cst_118 : f32 to vector<8x1xf32>
    %246 = arith.divf %244, %245 : vector<8x1xf32>
    %cst_119 = arith.constant 9.99999996E-13 : f32
    %247 = vector.broadcast %cst_119 : f32 to vector<8x1xf32>
    %248 = arith.addf %246, %247 : vector<8x1xf32>
    %249 = math.rsqrt %248 : vector<8x1xf32>
    %250 = vector.broadcast %249 : vector<8x1xf32> to vector<8x32xf32>
    %251 = arith.mulf %241, %250 : vector<8x32xf32>
    %252 = vector.broadcast %233 : vector<1x32xf32> to vector<8x32xf32>
    %253 = arith.mulf %251, %252 : vector<8x32xf32>
    %254 = vector.broadcast %235 : vector<1x32xf32> to vector<8x32xf32>
    %255 = arith.addf %253, %254 : vector<8x32xf32>
    %c1_120 = arith.constant 1 : index
    %c0_121 = arith.constant 0 : index
    %c0_122 = arith.constant 0 : index
    %256 = vector.load %arg14[%c1_120, %c0_121, %c0_122] : memref<2x32x64xf32, #tpu.memory_space<vmem>>, vector<1x32x64xf32>
    %257 = vector.shape_cast %256 : vector<1x32x64xf32> to vector<32x64xf32>
    %cst_123 = arith.constant dense<0.000000e+00> : vector<8x64xf32>
    %258 = tpu.matmul %255, %257, %cst_123 {dimension_numbers = #tpu.dot_dimension_numbers<[1], [0], [0], [1], [0, 0, 1, 1], [], []>} : vector<8x32xf32>, vector<32x64xf32>, vector<8x64xf32> -> vector<8x64xf32>
    %c1_124 = arith.constant 1 : index
    %c0_125 = arith.constant 0 : index
    %c0_126 = arith.constant 0 : index
    %259 = vector.load %arg15[%c1_124, %c0_125, %c0_126] : memref<2x1x64xf32, #tpu.memory_space<vmem>>, vector<1x1x64xf32>
    %260 = vector.shape_cast %259 : vector<1x1x64xf32> to vector<1x64xf32>
    %261 = vector.broadcast %260 : vector<1x64xf32> to vector<8x64xf32>
    %262 = arith.addf %258, %261 : vector<8x64xf32>
    %cst_127 = arith.constant 5.000000e-01 : f32
    %263 = vector.broadcast %cst_127 : f32 to vector<8x64xf32>
    %264 = arith.mulf %263, %262 : vector<8x64xf32>
    %cst_128 = arith.constant 4.471500e-02 : f32
    %265 = vector.broadcast %cst_128 : f32 to vector<8x64xf32>
    %266 = arith.mulf %265, %262 : vector<8x64xf32>
    %267 = arith.mulf %266, %262 : vector<8x64xf32>
    %268 = arith.mulf %267, %262 : vector<8x64xf32>
    %269 = arith.addf %262, %268 : vector<8x64xf32>
    %cst_129 = arith.constant 0.797884583 : f32
    %270 = vector.broadcast %cst_129 : f32 to vector<8x64xf32>
    %271 = arith.mulf %270, %269 : vector<8x64xf32>
    %272 = math.tanh %271 : vector<8x64xf32>
    %cst_130 = arith.constant 1.000000e+00 : f32
    %273 = vector.broadcast %cst_130 : f32 to vector<8x64xf32>
    %274 = arith.addf %273, %272 : vector<8x64xf32>
    %275 = arith.mulf %264, %274 : vector<8x64xf32>
    %c1_131 = arith.constant 1 : index
    %c0_132 = arith.constant 0 : index
    %c0_133 = arith.constant 0 : index
    %276 = vector.load %arg16[%c1_131, %c0_132, %c0_133] : memref<2x64x32xf32, #tpu.memory_space<vmem>>, vector<1x64x32xf32>
    %277 = vector.shape_cast %276 : vector<1x64x32xf32> to vector<64x32xf32>
    %cst_134 = arith.constant dense<0.000000e+00> : vector<8x32xf32>
    %278 = tpu.matmul %275, %277, %cst_134 {dimension_numbers = #tpu.dot_dimension_numbers<[1], [0], [0], [1], [0, 0, 1, 1], [], []>} : vector<8x64xf32>, vector<64x32xf32>, vector<8x32xf32> -> vector<8x32xf32>
    %c1_135 = arith.constant 1 : index
    %c0_136 = arith.constant 0 : index
    %c0_137 = arith.constant 0 : index
    %279 = vector.load %arg17[%c1_135, %c0_136, %c0_137] : memref<2x1x32xf32, #tpu.memory_space<vmem>>, vector<1x1x32xf32>
    %280 = vector.shape_cast %279 : vector<1x1x32xf32> to vector<1x32xf32>
    %281 = vector.broadcast %280 : vector<1x32xf32> to vector<8x32xf32>
    %282 = arith.addf %278, %281 : vector<8x32xf32>
    %283 = arith.addf %282, %255 : vector<8x32xf32>
    %c1_138 = arith.constant 1 : index
    %c0_139 = arith.constant 0 : index
    %c0_140 = arith.constant 0 : index
    %284 = vector.load %arg18[%c1_138, %c0_139, %c0_140] : memref<2x1x32xf32, #tpu.memory_space<vmem>>, vector<1x1x32xf32>
    %285 = vector.shape_cast %284 : vector<1x1x32xf32> to vector<1x32xf32>
    %c1_141 = arith.constant 1 : index
    %c0_142 = arith.constant 0 : index
    %c0_143 = arith.constant 0 : index
    %286 = vector.load %arg19[%c1_141, %c0_142, %c0_143] : memref<2x1x32xf32, #tpu.memory_space<vmem>>, vector<1x1x32xf32>
    %287 = vector.shape_cast %286 : vector<1x1x32xf32> to vector<1x32xf32>
    %cst_144 = arith.constant dense<0.000000e+00> : vector<8xf32>
    %288 = vector.multi_reduction <add>, %283, %cst_144 [1] : vector<8x32xf32> to vector<8xf32>
    %289 = vector.shape_cast %288 : vector<8xf32> to vector<8x1xf32>
    %cst_145 = arith.constant 3.200000e+01 : f32
    %290 = vector.broadcast %cst_145 : f32 to vector<8x1xf32>
    %291 = arith.divf %289, %290 : vector<8x1xf32>
    %292 = vector.broadcast %291 : vector<8x1xf32> to vector<8x32xf32>
    %293 = arith.subf %283, %292 : vector<8x32xf32>
    %294 = arith.mulf %293, %293 : vector<8x32xf32>
    %cst_146 = arith.constant dense<0.000000e+00> : vector<8xf32>
    %295 = vector.multi_reduction <add>, %294, %cst_146 [1] : vector<8x32xf32> to vector<8xf32>
    %296 = vector.shape_cast %295 : vector<8xf32> to vector<8x1xf32>
    %cst_147 = arith.constant 3.200000e+01 : f32
    %297 = vector.broadcast %cst_147 : f32 to vector<8x1xf32>
    %298 = arith.divf %296, %297 : vector<8x1xf32>
    %cst_148 = arith.constant 9.99999996E-13 : f32
    %299 = vector.broadcast %cst_148 : f32 to vector<8x1xf32>
    %300 = arith.addf %298, %299 : vector<8x1xf32>
    %301 = math.rsqrt %300 : vector<8x1xf32>
    %302 = vector.broadcast %301 : vector<8x1xf32> to vector<8x32xf32>
    %303 = arith.mulf %293, %302 : vector<8x32xf32>
    %304 = vector.broadcast %285 : vector<1x32xf32> to vector<8x32xf32>
    %305 = arith.mulf %303, %304 : vector<8x32xf32>
    %306 = vector.broadcast %287 : vector<1x32xf32> to vector<8x32xf32>
    %307 = arith.addf %305, %306 : vector<8x32xf32>
    %308 = vector.extract_strided_slice %307 {offsets = [0, 0], sizes = [1, 32], strides = [1, 1]} : vector<8x32xf32> to vector<1x32xf32>
    %c0_149 = arith.constant 0 : index
    %c0_150 = arith.constant 0 : index
    %309 = vector.load %arg20[%c0_149, %c0_150] : memref<32x32xf32, #tpu.memory_space<vmem>>, vector<32x32xf32>
    %cst_151 = arith.constant dense<0.000000e+00> : vector<1x32xf32>
    %310 = tpu.matmul %308, %309, %cst_151 {dimension_numbers = #tpu.dot_dimension_numbers<[1], [0], [0], [1], [0, 0, 1, 1], [], []>} : vector<1x32xf32>, vector<32x32xf32>, vector<1x32xf32> -> vector<1x32xf32>
    %c0_152 = arith.constant 0 : index
    %c0_153 = arith.constant 0 : index
    %311 = vector.load %arg21[%c0_152, %c0_153] : memref<1x32xf32, #tpu.memory_space<vmem>>, vector<1x32xf32>
    %312 = arith.addf %310, %311 : vector<1x32xf32>
    %313 = math.tanh %312 : vector<1x32xf32>
    %c0_154 = arith.constant 0 : index
    %c0_155 = arith.constant 0 : index
    %314 = vector.load %arg22[%c0_154, %c0_155] : memref<32x128xf32, #tpu.memory_space<vmem>>, vector<32x128xf32>
    %cst_156 = arith.constant dense<0.000000e+00> : vector<1x128xf32>
    %315 = tpu.matmul %313, %314, %cst_156 {dimension_numbers = #tpu.dot_dimension_numbers<[1], [0], [0], [1], [0, 0, 1, 1], [], []>} : vector<1x32xf32>, vector<32x128xf32>, vector<1x128xf32> -> vector<1x128xf32>
    %c0_157 = arith.constant 0 : index
    %c0_158 = arith.constant 0 : index
    %316 = vector.load %arg23[%c0_157, %c0_158] : memref<1x128xf32, #tpu.memory_space<vmem>>, vector<1x128xf32>
    %317 = arith.addf %315, %316 : vector<1x128xf32>
    %c0_159 = arith.constant 0 : index
    %c0_160 = arith.constant 0 : index
    %c0_161 = arith.constant 0 : index
    %318 = vector.load %arg24[%c0_159, %c0_160, %c0_161] : memref<1x1x128xf32, #tpu.memory_space<vmem>>, vector<1x1x128xf32>
    %319 = vector.shape_cast %318 : vector<1x1x128xf32> to vector<1x128xf32>
    %320 = vector.shape_cast %317 : vector<1x128xf32> to vector<1x1x128xf32>
    tpu.vector_store %arg24[%c0_159, %c0_160, %c0_161], %320 {strides = array<i32>} : memref<1x1x128xf32, #tpu.memory_space<vmem>>, vector<1x1x128xf32>,
    return
  }
  func.func @transform_0(%arg0: i32) -> (i32, i32, i32) {
    %c0_i32 = arith.constant 0 : i32
    %c0_i32_0 = arith.constant 0 : i32
    %c0_i32_1 = arith.constant 0 : i32
    return %arg0, %c0_i32, %c0_i32_0 : i32, i32, i32
  }
  func.func @transform_1(%arg0: i32) -> (i32, i32, i32) {
    %c0_i32 = arith.constant 0 : i32
    %c0_i32_0 = arith.constant 0 : i32
    %c0_i32_1 = arith.constant 0 : i32
    return %arg0, %c0_i32, %c0_i32_0 : i32, i32, i32
  }
  func.func @transform_2(%arg0: i32) -> (i32, i32) {
    %c0_i32 = arith.constant 0 : i32
    %c0_i32_0 = arith.constant 0 : i32
    %c0_i32_1 = arith.constant 0 : i32
    return %c0_i32, %c0_i32_0 : i32, i32
  }
  func.func @transform_3(%arg0: i32) -> (i32, i32) {
    %c0_i32 = arith.constant 0 : i32
    %c0_i32_0 = arith.constant 0 : i32
    %c0_i32_1 = arith.constant 0 : i32
    return %c0_i32, %c0_i32_0 : i32, i32
  }
  func.func @transform_4(%arg0: i32) -> (i32, i32) {
    %c0_i32 = arith.constant 0 : i32
    %c0_i32_0 = arith.constant 0 : i32
    %c0_i32_1 = arith.constant 0 : i32
    return %c0_i32, %c0_i32_0 : i32, i32
  }
  func.func @transform_5(%arg0: i32) -> (i32, i32) {
    %c0_i32 = arith.constant 0 : i32
    %c0_i32_0 = arith.constant 0 : i32
    %c0_i32_1 = arith.constant 0 : i32
    return %c0_i32, %c0_i32_0 : i32, i32
  }
  func.func @transform_6(%arg0: i32) -> (i32, i32) {
    %c0_i32 = arith.constant 0 : i32
    %c0_i32_0 = arith.constant 0 : i32
    %c0_i32_1 = arith.constant 0 : i32
    return %c0_i32, %c0_i32_0 : i32, i32
  }
  func.func @transform_7(%arg0: i32) -> (i32, i32, i32) {
    %c0_i32 = arith.constant 0 : i32
    %c0_i32_0 = arith.constant 0 : i32
    %c0_i32_1 = arith.constant 0 : i32
    %c0_i32_2 = arith.constant 0 : i32
    return %c0_i32, %c0_i32_0, %c0_i32_1 : i32, i32, i32
  }
  func.func @transform_8(%arg0: i32) -> (i32, i32, i32) {
    %c0_i32 = arith.constant 0 : i32
    %c0_i32_0 = arith.constant 0 : i32
    %c0_i32_1 = arith.constant 0 : i32
    %c0_i32_2 = arith.constant 0 : i32
    return %c0_i32, %c0_i32_0, %c0_i32_1 : i32, i32, i32
  }
  func.func @transform_9(%arg0: i32) -> (i32, i32, i32) {
    %c0_i32 = arith.constant 0 : i32
    %c0_i32_0 = arith.constant 0 : i32
    %c0_i32_1 = arith.constant 0 : i32
    %c0_i32_2 = arith.constant 0 : i32
    return %c0_i32, %c0_i32_0, %c0_i32_1 : i32, i32, i32
  }
  func.func @transform_10(%arg0: i32) -> (i32, i32, i32) {
    %c0_i32 = arith.constant 0 : i32
    %c0_i32_0 = arith.constant 0 : i32
    %c0_i32_1 = arith.constant 0 : i32
    %c0_i32_2 = arith.constant 0 : i32
    return %c0_i32, %c0_i32_0, %c0_i32_1 : i32, i32, i32
  }
  func.func @transform_11(%arg0: i32) -> (i32, i32, i32) {
    %c0_i32 = arith.constant 0 : i32
    %c0_i32_0 = arith.constant 0 : i32
    %c0_i32_1 = arith.constant 0 : i32
    %c0_i32_2 = arith.constant 0 : i32
    return %c0_i32, %c0_i32_0, %c0_i32_1 : i32, i32, i32
  }
  func.func @transform_12(%arg0: i32) -> (i32, i32, i32) {
    %c0_i32 = arith.constant 0 : i32
    %c0_i32_0 = arith.constant 0 : i32
    %c0_i32_1 = arith.constant 0 : i32
    %c0_i32_2 = arith.constant 0 : i32
    return %c0_i32, %c0_i32_0, %c0_i32_1 : i32, i32, i32
  }
  func.func @transform_13(%arg0: i32) -> (i32, i32, i32) {
    %c0_i32 = arith.constant 0 : i32
    %c0_i32_0 = arith.constant 0 : i32
    %c0_i32_1 = arith.constant 0 : i32
    %c0_i32_2 = arith.constant 0 : i32
    return %c0_i32, %c0_i32_0, %c0_i32_1 : i32, i32, i32
  }
  func.func @transform_14(%arg0: i32) -> (i32, i32, i32) {
    %c0_i32 = arith.constant 0 : i32
    %c0_i32_0 = arith.constant 0 : i32
    %c0_i32_1 = arith.constant 0 : i32
    %c0_i32_2 = arith.constant 0 : i32
    return %c0_i32, %c0_i32_0, %c0_i32_1 : i32, i32, i32
  }
  func.func @transform_15(%arg0: i32) -> (i32, i32, i32) {
    %c0_i32 = arith.constant 0 : i32
    %c0_i32_0 = arith.constant 0 : i32
    %c0_i32_1 = arith.constant 0 : i32
    %c0_i32_2 = arith.constant 0 : i32
    return %c0_i32, %c0_i32_0, %c0_i32_1 : i32, i32, i32
  }
  func.func @transform_16(%arg0: i32) -> (i32, i32, i32) {
    %c0_i32 = arith.constant 0 : i32
    %c0_i32_0 = arith.constant 0 : i32
    %c0_i32_1 = arith.constant 0 : i32
    %c0_i32_2 = arith.constant 0 : i32
    return %c0_i32, %c0_i32_0, %c0_i32_1 : i32, i32, i32
  }
  func.func @transform_17(%arg0: i32) -> (i32, i32, i32) {
    %c0_i32 = arith.constant 0 : i32
    %c0_i32_0 = arith.constant 0 : i32
    %c0_i32_1 = arith.constant 0 : i32
    %c0_i32_2 = arith.constant 0 : i32
    return %c0_i32, %c0_i32_0, %c0_i32_1 : i32, i32, i32
  }
  func.func @transform_18(%arg0: i32) -> (i32, i32, i32) {
    %c0_i32 = arith.constant 0 : i32
    %c0_i32_0 = arith.constant 0 : i32
    %c0_i32_1 = arith.constant 0 : i32
    %c0_i32_2 = arith.constant 0 : i32
    return %c0_i32, %c0_i32_0, %c0_i32_1 : i32, i32, i32
  }
  func.func @transform_19(%arg0: i32) -> (i32, i32) {
    %c0_i32 = arith.constant 0 : i32
    %c0_i32_0 = arith.constant 0 : i32
    %c0_i32_1 = arith.constant 0 : i32
    return %c0_i32, %c0_i32_0 : i32, i32
  }
  func.func @transform_20(%arg0: i32) -> (i32, i32) {
    %c0_i32 = arith.constant 0 : i32
    %c0_i32_0 = arith.constant 0 : i32
    %c0_i32_1 = arith.constant 0 : i32
    return %c0_i32, %c0_i32_0 : i32, i32
  }
  func.func @transform_21(%arg0: i32) -> (i32, i32) {
    %c0_i32 = arith.constant 0 : i32
    %c0_i32_0 = arith.constant 0 : i32
    %c0_i32_1 = arith.constant 0 : i32
    return %c0_i32, %c0_i32_0 : i32, i32
  }
  func.func @transform_22(%arg0: i32) -> (i32, i32) {
    %c0_i32 = arith.constant 0 : i32
    %c0_i32_0 = arith.constant 0 : i32
    %c0_i32_1 = arith.constant 0 : i32
    return %c0_i32, %c0_i32_0 : i32, i32
  }
  func.func @transform_23(%arg0: i32) -> (i32, i32, i32) {
    %c0_i32 = arith.constant 0 : i32
    %c0_i32_0 = arith.constant 0 : i32
    %c0_i32_1 = arith.constant 0 : i32
    return %arg0, %c0_i32, %c0_i32_0 : i32, i32, i32
  }
}

</mosaic_0001>

<bundles_post_ra>
// kernel: tpu_custom_call.1
= control target key start
LH: loop header
LB: loop body
LE: loop exit
PB: predicated region body
PF: predicated region fallthrough
CT: control target
= control target key end

     0   :  { %s2432_s0 = inlined_call_operand.vmem [shape: s32[2,8,1], index: 0, kind: input, shape index: {}]   ;;  %s2433_s1 = inlined_call_operand.vmem [shape: f32[2,1,8], index: 1, kind: input, shape index: {}]   ;;  %s2434_s2 = inlined_call_operand.vmem [shape: f32[128,32], index: 2, kind: input, shape index: {}]   ;;  %s2435_s3 = inlined_call_operand.vmem [shape: f32[8,32], index: 3, kind: input, shape index: {}]   ;;  %s2436_s4 = inlined_call_operand.vmem [shape: f32[1,32], index: 4, kind: input, shape index: {}]   ;;  %s2437_s5 = inlined_call_operand.vmem [shape: f32[1,32], index: 5, kind: input, shape index: {}]   ;;  %s2438_s6 = inlined_call_operand.vmem [shape: f32[1,32], index: 6, kind: input, shape index: {}]   ;;  %s2439_s7 = inlined_call_operand.vmem [shape: f32[2,32,96], index: 7, kind: input, shape index: {}]   ;;  %s2440_s8 = inlined_call_operand.vmem [shape: f32[2,1,96], index: 8, kind: input, shape index: {}]   ;;  %s2441_s9 = inlined_call_operand.vmem [shape: f32[2,32,32], index: 9, kind: input, shape index: {}]   ;;  %s2442_s10 = inlined_call_operand.vmem [shape: f32[2,1,32], index: 10, kind: input, shape index: {}]   ;;  %s2443_s11 = inlined_call_operand.vmem [shape: f32[2,1,32], index: 11, kind: input, shape index: {}]   ;;  %s2444_s12 = inlined_call_operand.vmem [shape: f32[2,1,32], index: 12, kind: input, shape index: {}]   ;;  %s2445_s13 = inlined_call_operand.vmem [shape: f32[2,32,64], index: 13, kind: input, shape index: {}]   ;;  %s2446_s14 = inlined_call_operand.vmem [shape: f32[2,1,64], index: 14, kind: input, shape index: {}]   ;;  %s2447_s15 = inlined_call_operand.vmem [shape: f32[2,64,32], index: 15, kind: input, shape index: {}]   ;;  %s2448_s16 = inlined_call_operand.vmem [shape: f32[2,1,32], index: 16, kind: input, shape index: {}]   ;;  %s2449_s17 = inlined_call_operand.vmem [shape: f32[2,1,32], index: 17, kind: input, shape index: {}]   ;;  %s2450_s18 = inlined_call_operand.vmem [shape: f32[2,1,32], index: 18, kind: input, shape index: {}]   ;;  %s2451_s19 = inlined_call_operand.vmem [shape: f32[32,32], index: 19, kind: input, shape index: {}]   ;;  %s2452_s20 = inlined_call_operand.vmem [shape: f32[1,32], index: 20, kind: input, shape index: {}]   ;;  %s2453_s21 = inlined_call_operand.vmem [shape: f32[32,128], index: 21, kind: input, shape index: {}]   ;;  %s2454_s22 = inlined_call_operand.vmem [shape: f32[1,128], index: 22, kind: input, shape index: {}]   ;;  %s2455_s23 = inlined_call_operand.hbm [shape: f32[2,1,128], index: 23, kind: output, shape index: {}]  }
   0x1   :  { %2471 = sst [smem:[#allocation12_spill]] %s2432_s0 }
   0x2   :  { %2472 = sst [smem:[#allocation13_spill]] %s2433_s1 }
   0x3   :  { %2473 = sst [smem:[#allocation14_spill]] %s2434_s2 }
   0x4   :  { %2474 = sst [smem:[#allocation15_spill]] %s2435_s3 }
   0x5   :  { %2475 = sst [smem:[#allocation16_spill]] %s2436_s4 }
   0x6   :  { %2476 = sst [smem:[#allocation17_spill]] %s2437_s5 }
   0x7   :  { %2477 = sst [smem:[#allocation18_spill]] %s2438_s6 }
   0x8   :  { %2478 = sst [smem:[#allocation19_spill]] %s2439_s7 }
   0x9   :  { %2479 = sst [smem:[#allocation20_spill]] %s2440_s8 }
   0xa   :  { %2480 = sst [smem:[#allocation21_spill]] %s2454_s22 }
   0xb   :  { %28 = vsyncpa [#allocation3], 0 }
   0xc   :  { %30 = vsyncpa [#allocation3 + $0x1], 0  ;;  %s2002_s4 = smov 0   ;;  %s2004_s30 = smov 0  }
   0xd   :  { %s2006_s24 = smov 0   ;;  %s2008_s25 = smov 0  }
   0xe LB: > { %2481 = sst [smem:[#allocation5_spill]] %s1859_s4  ;;  %s2023_s5 = sadd.s32 4294967295, %s1871_s25   ;;  %s1871_s25 = sphi %s2008_s25, %s2508_s25   ;;  %s1867_s24 = sphi %s2006_s24, %s2510_s24   ;;  %s1863_s30 = sphi %s2004_s30, %s2512_s30   ;;  %s1859_s4 = sphi %s2002_s4, %s2511_s4  }
   0xf   : > { %2482 = sst [smem:[#allocation6_spill]] %s1867_s24  ;;  %s1648_s1 = sadd.s32 4294967294, %s1871_s25  }
  0x10   : > { %2483 = sst [smem:[#allocation7_spill]] %s1871_s25  ;;  %s2027_s26 = sadd.s32 1, %s1871_s25  }
  0x11   : > { %2484 = sst [smem:[#allocation8_spill]] %s2027_s26  ;;  %s536_s2 = sadd.s32 1, %s1867_s24 }
  0x12   : > { %s533_s6 = ssub.s32 %s1871_s25, %s2027_s26  ;;  %p546_p0 = scmp.ne.s32.totalorder %s1867_s24, %s1863_s30 }
  0x13   : > { %p534_p1 = scmp.eq.s32.totalorder %s533_s6, 0  ;;  %p547_p2 = scmp.eq.s32.totalorder %s2023_s5, 1 }
  0x14   : > { %p552_p3 = scmp.ne.s32.totalorder %s1863_s30, %s1859_s4  ;;  %p553_p4 = scmp.eq.s32.totalorder %s1648_s1, 1 }
  0x15   : > { %s2038_s27 = scalar_select %p534_p1, %s1867_s24, %s536_s2  }
  0x16   : > { %p2040_p5 = por %p547_p2, %p546_p0  ;;  %p2044_p6 = por %p553_p4, %p552_p3 }
  0x17   : > { %2485 = sst [smem:[#allocation9_spill]] %s2038_s27  ;;  %p1651_p7 = scmp.ge.s32.totalorder %s1871_s25, 1 }
  0x18   : > { %s2486_s7 = scalar_select %p2040_p5, 1, 0 }
  0x19   : > { %s2488_s28 = scalar_select %p2044_p6, 1, 0 }
  0x1a   : > { %2487 = sst [smem:[#allocation10_spill]] %s2486_s7  ;;  %p647_p8 = scmp.lt.s32.totalorder %s1871_s25, 3 }
  0x1b   : > { %2489 = sst [smem:[#allocation11_spill]] %s2488_s28 }
  0x1c   : > { %p648_p9 = pnand %p1651_p7, %p647_p8 }
  0x1d   : > { %p712_p10 = scmp.lt.s32.totalorder (!%p648_p9), %s2023_s5, 1  ;;  %s2490_s0 = sld [smem:[#allocation14_spill]] (!%p648_p9) }
  0x1e   : > { %651 = sbr.rel (%p648_p9) target bundleno = 4511 (0x119f), region = 112  ;;  %s2491_s1 = sld [smem:[#allocation12_spill]] (!%p648_p9) }
  0x1f   : > { %s2492_s7 = sld [smem:[#allocation15_spill]] (!%p648_p9)  ;;  %s710_s27 = sand.u32 (!%p648_p9), 1, %s1863_s30  }
  0x20   : > { %s2493_s4 = sld [smem:[#allocation16_spill]] (!%p648_p9)  ;;  %s711_s3 = scalar_lea.vmem (!%p648_p9), [#allocation2], %s710_s27 }
  0x21   : > { %s2494_s22 = sld [smem:[#allocation19_spill]] (!%p648_p9)  ;;  %s1572_s24 = scalar_lea.sflag (!%p648_p9), [#allocation3], %s710_s27 }
  0x22   : > { %s2496_s25 = sld [smem:[#allocation18_spill]] (!%p648_p9) }
  0x23   : > { %v743_v0 = vld [vmem:[%s2490_s0 + $0x78] sm:$0xff]  ;;  %v742_v1 = vld [vmem:[%s2490_s0 + $0x70] sm:$0xff]  ;;  %v1873_v2 = vmov 0   ;;  %s2058_s6 = scalar_select %p712_p10, %s2023_s5, 1  ;;  %v741_v3 = vld [vmem:[%s2490_s0 + $0x68] sm:$0xff]  ;;  %v720_v18 = vlaneseq  ;;  %v1874_v21 = vmov 1.0  }
  0x24   : > { %1755 = vset.pattern.permute.xlu0 %v1873_v2  ;;  %745 = vmatpush.msra.mxu0 %v743_v0  ;;  %v740_v4 = vld [vmem:[%s2490_s0 + $0x60] sm:$0xff]  ;;  %v739_v5 = vld [vmem:[%s2490_s0 + $0x58] sm:$0xff]  ;;  %v738_v7 = vld [vmem:[%s2490_s0 + $0x50] sm:$0xff]  ;;  %vm772_vm1 = vcmask 261120   ;;  %v1875_v28 = vmov 32.0   ;;  %s2497_s8 = sld [smem:[#allocation20_spill]] }
  0x25   : > { %s1652_s26 = sshll.u32 %s2058_s6, 3  ;;  %v737_v8 = vld [vmem:[%s2490_s0 + $0x48] sm:$0xff]  ;;  %v736_v9 = vld [vmem:[%s2490_s0 + $0x40] sm:$0xff]  ;;  %v735_v10 = vld [vmem:[%s2490_s0 + $0x38] sm:$0xff]  ;;  %v721_v19 = vand.u32 127, %v720_v18  ;;  %1775 = vrcp.f32 %v1875_v28  ;;  %vm847_vm6 = vcmask 130048  }
  0x26   : > { %746 = vmatpush.msra.mxu0 %v742_v1  ;;  %s715_s2 = scalar_lea.vmem %s2491_s1, %s1652_s26  ;;  %v734_v11 = vld [vmem:[%s2490_s0 + $0x30] sm:$0xff]  ;;  %v733_v12 = vld [vmem:[%s2490_s0 + $0x28] sm:$0xff]  ;;  %v732_v13 = vld [vmem:[%s2490_s0 + $0x20] sm:$0xff]  ;;  %s1876_s1 = smov 112   ;;  %vm877_vm7 = vcmask 64512   ;;  %vm1103_vm11 = vcmask 523264  }
  0x27   : > { %v719_v6 = vld [vmem:[%s715_s2] sm:$0xff]  ;;  %v731_v14 = vld [vmem:[%s2490_s0 + $0x18] sm:$0xff]  ;;  %v730_v15 = vld [vmem:[%s2490_s0 + $0x10] sm:$0xff]  ;;  %s1877_s2 = smov 80   ;;  %s2466_s26 = smov 64  }
  0x28   : > { %747 = vmatpush.msra.mxu0 %v741_v3  ;;  %723 = vperm.xlu0 %1755, %v719_v6   ;;  %v729_v16 = vld [vmem:[%s2490_s0 + $0x8] sm:$0xff]  ;;  %v728_v17 = vld [vmem:[%s2490_s0] sm:$0xff]  ;;  %v816_v40 = vld [vmem:[%s2494_s22 + $0x18] sm:$0xff] }
  0x29   : > { %v744_v22 = vld [vmem:[%s2492_s7] sm:$0xff]  ;;  %836 = vmatpush.msra.mxu1 %v816_v40  ;;  %v815_v41 = vld [vmem:[%s2494_s22 + $0x10] sm:$0xff]  ;;  %v814_v42 = vld [vmem:[%s2494_s22 + $0x8] sm:$0xff]  ;;  %s2469_s7 = smov 96  }
  0x2a   : > { %748 = vmatpush.msra.mxu0 %v740_v4  ;;  %v1756_v23 = vld [vmem:[%s2493_s4] ss:$0 sm:$0xff]  ;;  %s2495_s4 = sld [smem:[#allocation17_spill]] }
  0x2b   : > { %v1776_v29 = vpop.eup %1775  ;;  %837 = vmatpush.msra.mxu1 %v815_v41  ;;  %v813_v43 = vld [vmem:[%s2494_s22] sm:$0xff] }
  0x2c   : > { %749 = vmatpush.msra.mxu0 %v739_v5  ;;  %v777_v30 = vmul.f32 32.0, %v1776_v29  ;;  %vm781_vm2 = vweird.f32 %v1776_v29  ;;  %v1758_v56 = vld [vmem:[%s2496_s25] ss:$0 sm:$0xff]  ;;  %s1829_s25 = scalar_lea.hbm %s2455_s23, 2 }
  0x2d   : > { %838 = vmatpush.msra.mxu1 %v814_v42  ;;  %v1759_v59 = vld [vmem:[%s2497_s8] ss:$0 sm:$0xff] }
  0x2e   : > { %750 = vmatpush.msra.mxu0 %v738_v7  ;;  %v778_v31 = vsub.f32 1.0, %v777_v30  ;;  %v1760_v40 = vld [vmem:[%s2442_s10] ss:$0 sm:$0xff] }
  0x2f   : > { %839 = vmatpush.msra.mxu1 %v813_v43 }
  0x30   : > { %751 = vmatpush.msra.mxu0 %v737_v8  ;;  %v779_v32 = vmul.f32 %v1776_v29, %v778_v31  ;;  %v1757_v53 = vld [vmem:[%s2495_s4] ss:$0 sm:$0xff]  ;;  %s2498_s4 = sld [smem:[#allocation13_spill]]  ;;  %v990_v31 = vld [vmem:[%s2441_s9 + $0x18] sm:$0xff] }
  0x32   : > { %752 = vmatpush.msra.mxu0 %v736_v9  ;;  %v780_v33 = vadd.f32 %v1776_v29, %v779_v32  ;;  %v989_v32 = vld [vmem:[%s2441_s9 + $0x10] sm:$0xff] }
  0x34   : > { %753 = vmatpush.msra.mxu0 %v735_v10  ;;  %v2113_v34 = vsel %vm781_vm2, %v1776_v29, %v780_v33  ;;  %v988_v33 = vld [vmem:[%s2441_s9 + $0x8] sm:$0xff] }
  0x36   : > { %754 = vmatpush.msra.mxu0 %v734_v11  ;;  %s718_s28 = scalar_lea.vmem %s2498_s4, %s2058_s6  ;;  %s2467_s6 = smov 48  }
  0x37   : > { %v810_v1 = vld [vmem:[%s718_s28] sm:$0x1]  ;;  %s2468_s28 = smov 16   ;;  %s2502_s4 = smov 16  }
  0x38   : > { %755 = vmatpush.msra.mxu0 %v733_v12  ;;  %v811_v2 = vsub.f32 1.0, %v810_v1 }
  0x3a   : > { %756 = vmatpush.msra.mxu0 %v732_v13  ;;  %v812_v3 = vmul.f32 -1e+09, %v811_v2  ;;  %v1762_v2 = vld [vmem:[%s2444_s12] ss:$0 sm:$0xff] }
  0x3c   : > { %757 = vmatpush.msra.mxu0 %v731_v14  ;;  %v2154_v4 = vperm.slane %v812_v3, 0 }
  0x3e   : > { %758 = vmatpush.msra.mxu0 %v730_v15 }
  0x40   : > { %759 = vmatpush.msra.mxu0 %v729_v16 }
  0x42   : > { %760 = vmatpush.msra.mxu0 %v728_v17 }
  0x9a   : > { %v724_v20 = vpop.permute.xlu0 %723 }
  0x9b   : > { %vm725_vm0 = vcmp.eq.s32.totalorder %v721_v19, %v724_v20 }
  0x9c   : > { %1654 = vmatmul.msk.f32.vlgmr.msra.gmra.mxu0 %vm725_vm0, %v1874_v21 }
 0x119   : > { %v762_v24 = vpop.f32.mrf.mxu0 }
 0x11a   : > { %v763_v25 = vadd.f32 %v762_v24, %v744_v22 }
 0x11c   : > { %v769_v26 = vadd.f32 %v1756_v23, %v763_v25 }
 0x11e   : > { %v773_v27 = vsel %vm772_vm1, %v769_v26, 0.0 }
 0x11f   : > { %774 = vadd.xlane.f32.xlu0 %v773_v27 }
 0x192   : > { %v775_v35 = vpop.xlane.xlu0 %774 }
 0x193   : > { %v783_v36 = vmul.f32 %v2113_v34, %v775_v35 }
 0x195   : > { %v784_v37 = vsub.f32 %v769_v26, %v783_v36  ;;  %v987_v36 = vld [vmem:[%s2441_s9] sm:$0xff] }
 0x197   : > { %v785_v38 = vmul.f32 %v784_v37, %v784_v37 }
 0x199   : > { %v786_v39 = vsel %vm772_vm1, %v785_v38, 0.0 }
 0x19a   : > { %787 = vadd.xlane.f32.xlu1 %v786_v39 }
 0x20d   : > { %v788_v44 = vpop.xlane.xlu1 %787 }
 0x20e   : > { %v789_v45 = vmul.f32 %v788_v44, %v2113_v34 }
 0x210   : > { %v790_v46 = vadd.f32 1e-12, %v789_v45 }
 0x212   : > { %1777 = vrsqrt.f32 %v790_v46  ;;  %vm797_vm4 = vweird.f32 %v790_v46 }
 0x218   : > { %v1778_v47 = vpop.eup %1777 }
 0x219   : > { %v792_v48 = vmul.f32 %v1778_v47, %v790_v46  ;;  %vm798_vm3 = vweird.f32 %v1778_v47 }
 0x21a   : > { %vm799_vm5 = vmor %vm797_vm4, %vm798_vm3 }
 0x21b   : > { %v793_v49 = vmul.f32 %v1778_v47, %v792_v48 }
 0x21d   : > { %v794_v50 = vmul.f32 0.5, %v793_v49 }
 0x21f   : > { %v795_v51 = vsub.f32 1.5, %v794_v50  ;;  %v1054_v50 = vld [vmem:[%s2445_s13 + $0x18] sm:$0xff] }
 0x221   : > { %v796_v52 = vmul.f32 %v1778_v47, %v795_v51  ;;  %v1053_v51 = vld [vmem:[%s2445_s13 + $0x10] sm:$0xff] }
 0x223   : > { %v800_v54 = vsel %vm799_vm5, %v1778_v47, %v796_v52  ;;  %v1052_v52 = vld [vmem:[%s2445_s13 + $0x8] sm:$0xff] }
 0x224   : > { %v801_v55 = vmul.f32 %v800_v54, %v784_v37 }
 0x226   : > { %v805_v57 = vmul.f32 %v1757_v53, %v801_v55  ;;  %v1051_v53 = vld [vmem:[%s2445_s13] sm:$0xff] }
 0x228   : > { %v2136_v58 = vadd.f32 %v1758_v56, %v805_v57 }
 0x22a   : > { %1655 = vmatmul.msk.f32.vlgmr.msra.gmra.mxu1 %vm772_vm1, %v2136_v58 }
 0x2a7   : > { %v841_v60 = vpop.f32.mrf.mxu1 }
 0x2a8   : > { %v842_v61 = vadd.f32 %v1759_v59, %v841_v60 }
 0x2aa   : > { %915 = vrot.lane.b32.xlu2 %v842_v61, %s1876_s1  ;;  %917 = vrot.lane.b32.xlu1 %v842_v61, %s1877_s2 }
 0x2b2   : > { %845 = vrot.lane.b32.xlu2 %v842_v61, %s2469_s7  ;;  %s1582_s7 = sshll.u32 %s711_s3, 4  ;;  %s1583_s7 = int_to_ptr.vmem [resolvable:$true] %s1582_s7 }
 0x304   : > { %v916_v62 = vpop.permute.xlu2 %915 }
 0x30c   : > { %v846_v63 = vpop.permute.xlu2 %845 }
 0x30d   : > { %1656 = vmatpush.xpose.msk.msra.mxu2 %vm847_vm6, %v846_v63  ;;  %v1761_v63 = vld [vmem:[%s2443_s11] ss:$0 sm:$0xff] }
 0x310   : > { %1657 = vmatmul.msk.f32.vlgmr.msra.gmra.mxu2 %vm847_vm6, %v842_v61 }
 0x31c   : > { %v918_v0 = vpop.permute.xlu1 %917 }
 0x31d   : > { %1659 = vmatpush.xpose.msk.msra.mxu3 %vm847_vm6, %v918_v0 }
 0x320   : > { %1660 = vmatmul.msk.f32.vlgmr.msra.gmra.mxu3 %vm847_vm6, %v916_v62 }
 0x321   : > { %1074 = vmatpush.msrb.mxu3 %v1054_v50  ;;  %v1765_v50 = vld [vmem:[%s2449_s17] ss:$0 sm:$0xff] }
 0x323   : > { %1075 = vmatpush.msrb.mxu3 %v1053_v51 }
 0x325   : > { %1076 = vmatpush.msrb.mxu3 %v1052_v52 }
 0x327   : > { %1077 = vmatpush.msrb.mxu3 %v1051_v53  ;;  %v1766_v53 = vld [vmem:[%s2450_s18] ss:$0 sm:$0xff] }
 0x393   : > { %v869_v5 = vpop.f32.mrf.mxu2 }
 0x394   : > { %v872_v6 = vmul.f32 0.25, %v869_v5 }
 0x396   : > { %v876_v7 = vadd.f32 %v2154_v4, %v872_v6  ;;  %v1098_v6 = vld [vmem:[%s2447_s15 + $0x38] sm:$0xff] }
 0x398   : > { %v878_v8 = vsel %vm877_vm7, %v876_v7, -inf }
 0x399   : > { %879 = vmax.xlane.f32.xlu1 %v878_v8  ;;  %v1096_v8 = vld [vmem:[%s2447_s15 + $0x28] sm:$0xff] }
 0x3a3   : > { %v940_v9 = vpop.f32.mrf.mxu3 }
 0x3a4   : > { %v943_v10 = vmul.f32 0.25, %v940_v9  ;;  %v1095_v9 = vld [vmem:[%s2447_s15 + $0x20] sm:$0xff] }
 0x3a6   : > { %v944_v11 = vadd.f32 %v943_v10, %v2154_v4  ;;  %v1094_v10 = vld [vmem:[%s2447_s15 + $0x18] sm:$0xff] }
 0x3a8   : > { %v945_v12 = vsel %vm877_vm7, %v944_v11, -inf }
 0x3a9   : > { %946 = vmax.xlane.f32.xlu2 %v945_v12  ;;  %v1092_v12 = vld [vmem:[%s2447_s15 + $0x8] sm:$0xff] }
 0x3c1   : > { %956 = vrot.lane.b32.xlu2 %v842_v61, %s2467_s6  ;;  %s2499_s6 = smov 96  }
 0x40c   : > { %v880_v13 = vpop.xlane.xlu1 %879 }
 0x40d   : > { %v881_v16 = vsub.f32 %v876_v7, %v880_v13  ;;  %v1097_v7 = vld [vmem:[%s2447_s15 + $0x30] sm:$0xff]  ;;  %v1091_v13 = vld [vmem:[%s2447_s15] sm:$0xff] }
 0x40f   : > { %v882_v18 = vmul.f32 1.442695, %v881_v16 }
 0x41c   : > { %v947_v14 = vpop.xlane.xlu2 %946 }
 0x41d   : > { %v948_v15 = vsub.f32 %v944_v11, %v947_v14  ;;  %v1093_v11 = vld [vmem:[%s2447_s15 + $0x10] sm:$0xff]  ;;  %v1763_v14 = vld [vmem:[%s2446_s14] ss:$0 sm:$0xff] }
 0x41f   : > { %v949_v17 = vmul.f32 1.442695, %v948_v15 }
 0x421   : > { %1779 = vpow2.f32 %v949_v17 }
 0x422   : > { %1781 = vpow2.f32 %v882_v18 }
 0x424   : > { %v957_v19 = vpop.permute.xlu2 %956 }
 0x425   : > { %977 = vmatpush.msrb.mxu2 %v957_v19 }
 0x427   : > { %v1780_v20 = vpop.eup %1779  ;;  %1115 = vmatpush.msra.mxu2 %v1098_v6 }
 0x428   : > { %v951_v21 = vsel %vm877_vm7, %v1780_v20, 0.0  ;;  %v1782_v22 = vpop.eup %1781 }
 0x429   : > { %952 = vadd.xlane.f32.xlu0 %v951_v21  ;;  %v884_v23 = vsel %vm877_vm7, %v1782_v22, 0.0  ;;  %1116 = vmatpush.msra.mxu2 %v1097_v7 }
 0x42b   : > { %1117 = vmatpush.msra.mxu2 %v1096_v8 }
 0x42d   : > { %1118 = vmatpush.msra.mxu2 %v1095_v9 }
 0x42f   : > { %1119 = vmatpush.msra.mxu2 %v1094_v10 }
 0x431   : > { %885 = vadd.xlane.f32.xlu0 %v884_v23  ;;  %1120 = vmatpush.msra.mxu2 %v1093_v11 }
 0x433   : > { %1121 = vmatpush.msra.mxu2 %v1092_v12 }
 0x435   : > { %1122 = vmatpush.msra.mxu2 %v1091_v13 }
 0x445   : > { %889 = vrot.lane.b32.xlu0 %v842_v61, %s2466_s26  ;;  %s2504_s26 = sld [smem:[#allocation21_spill]] }
 0x49c   : > { %v953_v24 = vpop.xlane.xlu0 %952 }
 0x49d   : > { %1783 = vrcp.f32 %v953_v24 }
 0x4a3   : > { %v1784_v25 = vpop.eup %1783 }
 0x4a4   : > { %v955_v26 = vmul.f32 %v1784_v25, %v1780_v20  ;;  %v886_v27 = vpop.xlane.xlu0 %885 }
 0x4a5   : > { %1785 = vrcp.f32 %v886_v27 }
 0x4a6   : > { %1661 = vmatmul.msk.f32.vlgmr.msrb.gmra.mxu2 %vm877_vm7, %v955_v26  ;;  %v1764_v26 = vld [vmem:[%s2448_s16] ss:$0 sm:$0xff] }
 0x4ab   : > { %v1786_v28 = vpop.eup %1785 }
 0x4ac   : > { %v888_v30 = vmul.f32 %v1786_v28, %v1782_v22 }
 0x4b7   : > { %v890_v29 = vpop.permute.xlu0 %889 }
 0x4b8   : > { %910 = vmatpush.msrb.mxu1 %v890_v29 }
 0x4b9   : > { %1658 = vmatmul.msk.f32.vlgmr.msrb.gmra.mxu1 %vm877_vm7, %v888_v30 }
 0x4ba   : > { %1010 = vmatpush.msra.mxu1 %v990_v31 }
 0x4bc   : > { %1011 = vmatpush.msra.mxu1 %v989_v32 }
 0x4be   : > { %1012 = vmatpush.msra.mxu1 %v988_v33 }
 0x4c0   : > { %1013 = vmatpush.msra.mxu1 %v987_v36 }
 0x529   : > { %v979_v35 = vpop.f32.mrf.mxu2 }
 0x52a   : > { %983 = vrot.lane.b32.xlu1 %v979_v35, %s2468_s28 }
 0x536   : > { %v912_v37 = vpop.f32.mrf.mxu1 }
 0x59c   : > { %v984_v38 = vpop.permute.xlu1 %983 }
 0x59d   : > { %v986_v39 = vsel %vm847_vm6, %v912_v37, %v984_v38  ;;  %v1668_v37 = vld [vmem:[%s2494_s22 + $0x38] sm:$0xff]  ;;  %v1667_v38 = vld [vmem:[%s2494_s22 + $0x30] sm:$0xff] }
 0x59e   : > { %1662 = vmatmul.msk.f32.vlgmr.msra.gmra.mxu1 %vm772_vm1, %v986_v39  ;;  %v1666_v39 = vld [vmem:[%s2494_s22 + $0x28] sm:$0xff] }
 0x59f   : > { %1185 = vmatpush.msrb.mxu1 %v1668_v37 }
 0x5a1   : > { %1186 = vmatpush.msrb.mxu1 %v1667_v38 }
 0x5a3   : > { %1187 = vmatpush.msrb.mxu1 %v1666_v39 }
 0x61b   : > { %v1015_v41 = vpop.f32.mrf.mxu1 }
 0x61c   : > { %v1016_v42 = vadd.f32 %v1760_v40, %v1015_v41  ;;  %v1665_v40 = vld [vmem:[%s2494_s22 + $0x20] sm:$0xff] }
 0x61d   : > { %1188 = vmatpush.msrb.mxu1 %v1665_v40 }
 0x61e   : > { %v1018_v43 = vadd.f32 %v1016_v42, %v2136_v58 }
 0x620   : > { %v1021_v44 = vsel %vm772_vm1, %v1018_v43, 0.0 }
 0x621   : > { %1022 = vadd.xlane.f32.xlu2 %v1021_v44 }
 0x694   : > { %v1023_v45 = vpop.xlane.xlu2 %1022 }
 0x695   : > { %v1024_v46 = vmul.f32 %v1023_v45, %v2113_v34 }
 0x697   : > { %v1025_v47 = vsub.f32 %v1018_v43, %v1024_v46 }
 0x699   : > { %v1026_v48 = vmul.f32 %v1025_v47, %v1025_v47 }
 0x69b   : > { %v1027_v49 = vsel %vm772_vm1, %v1026_v48, 0.0 }
 0x69c   : > { %1028 = vadd.xlane.f32.xlu0 %v1027_v49 }
 0x70f   : > { %v1029_v54 = vpop.xlane.xlu0 %1028 }
 0x710   : > { %v1030_v55 = vmul.f32 %v1029_v54, %v2113_v34 }
 0x712   : > { %v1031_v56 = vadd.f32 1e-12, %v1030_v55 }
 0x714   : > { %1787 = vrsqrt.f32 %v1031_v56  ;;  %vm1038_vm9 = vweird.f32 %v1031_v56 }
 0x71a   : > { %v1788_v57 = vpop.eup %1787 }
 0x71b   : > { %v1033_v58 = vmul.f32 %v1788_v57, %v1031_v56  ;;  %vm1039_vm8 = vweird.f32 %v1788_v57  ;;  %v1767_v56 = vld [vmem:[%s2497_s8 + $0x1] ss:$0 sm:$0xff] }
 0x71c   : > { %vm1040_vm10 = vmor %vm1038_vm9, %vm1039_vm8 }
 0x71d   : > { %v1034_v59 = vmul.f32 %v1788_v57, %v1033_v58 }
 0x71f   : > { %v1035_v60 = vmul.f32 0.5, %v1034_v59 }
 0x721   : > { %v1036_v61 = vsub.f32 1.5, %v1035_v60 }
 0x723   : > { %v1037_v62 = vmul.f32 %v1788_v57, %v1036_v61 }
 0x725   : > { %v1041_v0 = vsel %vm1040_vm10, %v1788_v57, %v1037_v62 }
 0x726   : > { %v1042_v1 = vmul.f32 %v1041_v0, %v1025_v47 }
 0x728   : > { %v1046_v3 = vmul.f32 %v1761_v63, %v1042_v1 }
 0x72a   : > { %v1050_v5 = vadd.f32 %v1762_v2, %v1046_v3 }
 0x72c   : > { %1663 = vmatmul.msk.f32.vlgmr.msrb.gmra.mxu3 %vm772_vm1, %v1050_v5 }
 0x7af   : > { %v1079_v15 = vpop.f32.mrf.mxu3 }
 0x7b0   : > { %v1080_v16 = vadd.f32 %v1763_v14, %v1079_v15 }
 0x7b2   : > { %v1083_v17 = vmul.f32 0.044715, %v1080_v16  ;;  %v1082_v23 = vmul.f32 0.5, %v1080_v16 }
 0x7b4   : > { %v1084_v18 = vmul.f32 %v1083_v17, %v1080_v16 }
 0x7b6   : > { %v1085_v19 = vmul.f32 %v1084_v18, %v1080_v16 }
 0x7b8   : > { %v1086_v20 = vadd.f32 %v1085_v19, %v1080_v16 }
 0x7ba   : > { %v1087_v21 = vmul.f32 0.7978846, %v1086_v20 }
 0x7bc   : > { %1789 = vtanh.f32 %v1087_v21 }
 0x7c2   : > { %v1790_v22 = vpop.eup %1789 }
 0x7c3   : > { %v1089_v24 = vadd.f32 1.0, %v1790_v22 }
 0x7c5   : > { %v1090_v25 = vmul.f32 %v1089_v24, %v1082_v23  ;;  %v1680_v24 = vld [vmem:[%s2441_s9 + $0x38] sm:$0xff] }
 0x7c6   : > { %1356 = vmatpush.msrb.mxu0 %v1680_v24 }
 0x7c7   : > { %1664 = vmatmul.msk.f32.vlgmr.msra.gmra.mxu2 %vm1103_vm11, %v1090_v25  ;;  %v1679_v25 = vld [vmem:[%s2441_s9 + $0x30] sm:$0xff] }
 0x7c8   : > { %1357 = vmatpush.msrb.mxu0 %v1679_v25 }
 0x84a   : > { %v1124_v27 = vpop.f32.mrf.mxu2 }
 0x84b   : > { %v1125_v28 = vadd.f32 %v1764_v26, %v1124_v27  ;;  %v1678_v26 = vld [vmem:[%s2441_s9 + $0x28] sm:$0xff] }
 0x84c   : > { %1358 = vmatpush.msrb.mxu0 %v1678_v26 }
 0x84d   : > { %v1127_v29 = vadd.f32 %v1125_v28, %v1050_v5  ;;  %v1677_v28 = vld [vmem:[%s2441_s9 + $0x20] sm:$0xff] }
 0x84e   : > { %1359 = vmatpush.msrb.mxu0 %v1677_v28  ;;  %v1516_v28 = vld [vmem:[%s2451_s19 + $0x18] sm:$0xff] }
 0x84f   : > { %v1130_v30 = vsel %vm772_vm1, %v1127_v29, 0.0 }
 0x850   : > { %1131 = vadd.xlane.f32.xlu1 %v1130_v30 }
 0x8c3   : > { %v1132_v31 = vpop.xlane.xlu1 %1131 }
 0x8c4   : > { %v1133_v32 = vmul.f32 %v1132_v31, %v2113_v34 }
 0x8c6   : > { %v1134_v33 = vsub.f32 %v1127_v29, %v1133_v32  ;;  %v1768_v32 = vld [vmem:[%s2442_s10 + $0x1] ss:$0 sm:$0xff] }
 0x8c8   : > { %v1135_v35 = vmul.f32 %v1134_v33, %v1134_v33 }
 0x8ca   : > { %v1136_v36 = vsel %vm772_vm1, %v1135_v35, 0.0 }
 0x8cb   : > { %1137 = vadd.xlane.f32.xlu2 %v1136_v36 }
 0x93e   : > { %v1138_v41 = vpop.xlane.xlu2 %1137 }
 0x93f   : > { %v1139_v42 = vmul.f32 %v1138_v41, %v2113_v34 }
 0x941   : > { %v1140_v43 = vadd.f32 1e-12, %v1139_v42 }
 0x943   : > { %1791 = vrsqrt.f32 %v1140_v43  ;;  %vm1147_vm13 = vweird.f32 %v1140_v43 }
 0x949   : > { %v1792_v44 = vpop.eup %1791 }
 0x94a   : > { %v1142_v45 = vmul.f32 %v1792_v44, %v1140_v43  ;;  %vm1148_vm12 = vweird.f32 %v1792_v44  ;;  %v1688_v43 = vld [vmem:[%s2445_s13 + $0x38] sm:$0xff] }
 0x94b   : > { %vm1149_vm14 = vmor %vm1147_vm13, %vm1148_vm12 }
 0x94c   : > { %v1143_v46 = vmul.f32 %v1792_v44, %v1142_v45  ;;  %v1686_v45 = vld [vmem:[%s2445_s13 + $0x28] sm:$0xff] }
 0x94e   : > { %v1144_v47 = vmul.f32 0.5, %v1143_v46  ;;  %v1685_v46 = vld [vmem:[%s2445_s13 + $0x20] sm:$0xff] }
 0x950   : > { %v1145_v48 = vsub.f32 1.5, %v1144_v47 }
 0x952   : > { %v1146_v49 = vmul.f32 %v1792_v44, %v1145_v48 }
 0x954   : > { %v1150_v51 = vsel %vm1149_vm14, %v1792_v44, %v1146_v49  ;;  %v1687_v44 = vld [vmem:[%s2445_s13 + $0x30] sm:$0xff] }
 0x955   : > { %v1151_v52 = vmul.f32 %v1150_v51, %v1134_v33 }
 0x957   : > { %v1155_v54 = vmul.f32 %v1765_v50, %v1151_v52 }
 0x959   : > { %v2261_v55 = vadd.f32 %v1766_v53, %v1155_v54 }
 0x95b   : > { %1670 = vmatmul.msk.f32.vlgmr.msrb.gmra.mxu1 %vm772_vm1, %v2261_v55 }
 0x9d8   : > { %v1190_v57 = vpop.f32.mrf.mxu1 }
 0x9d9   : > { %v1191_v58 = vadd.f32 %v1767_v56, %v1190_v57  ;;  %v1769_v56 = vld [vmem:[%s2443_s11 + $0x1] ss:$0 sm:$0xff] }
 0x9db   : > { %1259 = vrot.lane.b32.xlu1 %v1191_v58, %s1876_s1  ;;  %1261 = vrot.lane.b32.xlu2 %v1191_v58, %s1877_s2  ;;  %s2500_s1 = smov 48   ;;  %s2501_s2 = smov 64  }
 0x9dc   : > { %1194 = vrot.lane.b32.xlu0 %v1191_v58, %s2499_s6  ;;  %s1580_s6 = scalar_lea.hbm %s2455_s23, %s2023_s5 }
 0x9dd   : > { %s1584_s28 = sshll.u32 %s1580_s6, 4  ;;  %s1585_s28 = int_to_ptr.hbm [resolvable:$true] %s1584_s28 }
 0x9de   : > { %s1823_s0 = sshra.s32 %s1585_s28, 4  ;;  %s1824_s0 = int_to_ptr.hbm [resolvable:$true] %s1823_s0 }
 0x9df   : > { %s1825_s8 = scalar_lea.hbm %s1824_s0, 1  ;;  %p1830_p0 = scmp.lt.s32.totalorder %s1824_s0, %s2455_s23 }
 0x9e0   : > { %p1826_p11 = scmp.ne.s32.totalorder %s1824_s0, %s1825_s8  ;;  %p1831_p1 = scmp.lt.s32.totalorder %s1829_s25, %s1825_s8 }
 0x9e2   : > { %p1827_p12 = pnand %p1826_p11, %p2040_p5  ;;  %p1832_p2 = por %p1831_p1, %p1830_p0 }
 0x9e4   : > { %p1828_p13 = pneg %p1827_p12 }
 0x9e6   : > { %p1833_p3 = pnand %p1832_p2, %p1828_p13 }
 0xa35   : > { %v1262_v60 = vpop.permute.xlu2 %1261 }
 0xa4d   : > { %v1260_v61 = vpop.permute.xlu1 %1259 }
 0xa4e   : > { %v1195_v59 = vpop.permute.xlu0 %1194 }
 0xa4f   : > { %1671 = vmatpush.xpose.msk.msra.mxu3 %vm847_vm6, %v1195_v59  ;;  %v1770_v59 = vld [vmem:[%s2444_s12 + $0x1] ss:$0 sm:$0xff] }
 0xa52   : > { %1672 = vmatmul.msk.f32.vlgmr.msra.gmra.mxu3 %vm847_vm6, %v1191_v58 }
 0xa53   : > { %1674 = vmatpush.xpose.msk.msrb.mxu3 %vm847_vm6, %v1262_v60 }
 0xa5a   : > { %1675 = vmatmul.msk.f32.vlgmr.msrb.gmra.mxu3 %vm847_vm6, %v1260_v61 }
 0xad5   : > { %v1217_v62 = vpop.f32.mrf.mxu3 }
 0xad6   : > { %v1220_v63 = vmul.f32 0.25, %v1217_v62  ;;  %v1698_v62 = vld [vmem:[%s2447_s15 + $0x78] sm:$0xff] }
 0xad7   : > { %1466 = vmatpush.msra.mxu3 %v1698_v62 }
 0xad8   : > { %v1221_v0 = vadd.f32 %v1220_v63, %v2154_v4  ;;  %v1697_v63 = vld [vmem:[%s2447_s15 + $0x70] sm:$0xff] }
 0xad9   : > { %1467 = vmatpush.msra.mxu3 %v1697_v63 }
 0xada   : > { %v1222_v1 = vsel %vm877_vm7, %v1221_v0, -inf }
 0xadb   : > { %1223 = vmax.xlane.f32.xlu2 %v1222_v1  ;;  %v1695_v1 = vld [vmem:[%s2447_s15 + $0x60] sm:$0xff] }
 0xadd   : > { %v1284_v2 = vpop.f32.mrf.mxu3 }
 0xade   : > { %v1287_v3 = vmul.f32 0.25, %v1284_v2  ;;  %v1694_v2 = vld [vmem:[%s2447_s15 + $0x58] sm:$0xff] }
 0xae0   : > { %v1288_v5 = vadd.f32 %v1287_v3, %v2154_v4  ;;  %v1693_v3 = vld [vmem:[%s2447_s15 + $0x50] sm:$0xff] }
 0xae2   : > { %v1289_v6 = vsel %vm877_vm7, %v1288_v5, -inf }
 0xae3   : > { %1290 = vmax.xlane.f32.xlu0 %v1289_v6  ;;  %v1691_v6 = vld [vmem:[%s2447_s15 + $0x40] sm:$0xff] }
 0xaf7   : > { %1300 = vrot.lane.b32.xlu0 %v1191_v58, %s2500_s1 }
 0xb4e   : > { %v1224_v7 = vpop.xlane.xlu2 %1223 }
 0xb4f   : > { %v1225_v8 = vsub.f32 %v1221_v0, %v1224_v7  ;;  %v1696_v0 = vld [vmem:[%s2447_s15 + $0x68] sm:$0xff]  ;;  %v1771_v7 = vld [vmem:[%s2446_s14 + $0x1] ss:$0 sm:$0xff] }
 0xb50   : > { %1468 = vmatpush.msra.mxu3 %v1696_v0 }
 0xb51   : > { %v1226_v9 = vmul.f32 1.442695, %v1225_v8 }
 0xb52   : > { %1469 = vmatpush.msra.mxu3 %v1695_v1 }
 0xb53   : > { %1793 = vpow2.f32 %v1226_v9 }
 0xb54   : > { %1470 = vmatpush.msra.mxu3 %v1694_v2 }
 0xb56   : > { %v1291_v10 = vpop.xlane.xlu0 %1290  ;;  %1471 = vmatpush.msra.mxu3 %v1693_v3 }
 0xb57   : > { %v1292_v11 = vsub.f32 %v1288_v5, %v1291_v10  ;;  %v1692_v5 = vld [vmem:[%s2447_s15 + $0x48] sm:$0xff] }
 0xb58   : > { %1472 = vmatpush.msra.mxu3 %v1692_v5 }
 0xb59   : > { %v1794_v12 = vpop.eup %1793  ;;  %v1293_v13 = vmul.f32 1.442695, %v1292_v11 }
 0xb5a   : > { %v1228_v14 = vsel %vm877_vm7, %v1794_v12, 0.0  ;;  %1473 = vmatpush.msra.mxu3 %v1691_v6 }
 0xb5b   : > { %1795 = vpow2.f32 %v1293_v13  ;;  %1229 = vadd.xlane.f32.xlu2 %v1228_v14 }
 0xb61   : > { %v1796_v15 = vpop.eup %1795 }
 0xb62   : > { %v1295_v4 = vsel %vm877_vm7, %v1796_v15, 0.0 }
 0xb63   : > { %1296 = vadd.xlane.f32.xlu1 %v1295_v4 }
 0xb69   : > { %v1301_v16 = vpop.permute.xlu0 %1300 }
 0xb6a   : > { %1321 = vmatpush.msrb.mxu2 %v1301_v16 }
 0xb6c   : > { %1533 = vmatpush.msra.mxu2 %v1516_v28 }
 0xb73   : > { %1233 = vrot.lane.b32.xlu2 %v1191_v58, %s2501_s2 }
 0xbce   : > { %v1230_v17 = vpop.xlane.xlu2 %1229 }
 0xbcf   : > { %1797 = vrcp.f32 %v1230_v17 }
 0xbd5   : > { %v1798_v18 = vpop.eup %1797 }
 0xbd6   : > { %v1232_v19 = vmul.f32 %v1798_v18, %v1794_v12  ;;  %v1297_v20 = vpop.xlane.xlu1 %1296  ;;  %v1234_v21 = vpop.permute.xlu2 %1233  ;;  %v1772_v18 = vld [vmem:[%s2448_s16 + $0x1] ss:$0 sm:$0xff] }
 0xbd7   : > { %1799 = vrcp.f32 %v1297_v20  ;;  %1254 = vmatpush.msra.mxu1 %v1234_v21 }
 0xbd8   : > { %1673 = vmatmul.msk.f32.vlgmr.msra.gmra.mxu1 %vm877_vm7, %v1232_v19 }
 0xbd9   : > { %1424 = vmatpush.msrb.mxu1 %v1688_v43 }
 0xbdb   : > { %1425 = vmatpush.msrb.mxu1 %v1687_v44 }
 0xbdd   : > { %v1800_v22 = vpop.eup %1799  ;;  %1426 = vmatpush.msrb.mxu1 %v1686_v45 }
 0xbde   : > { %v1299_v23 = vmul.f32 %v1800_v22, %v1796_v15 }
 0xbdf   : > { %1427 = vmatpush.msrb.mxu1 %v1685_v46 }
 0xbe0   : > { %1676 = vmatmul.msk.f32.vlgmr.msrb.gmra.mxu2 %vm877_vm7, %v1299_v23 }
 0xc55   : > { %v1256_v29 = vpop.f32.mrf.mxu1 }
 0xc63   : > { %v1323_v27 = vpop.f32.mrf.mxu2 }
 0xc64   : > { %1327 = vrot.lane.b32.xlu1 %v1323_v27, %s2502_s4 }
 0xcd6   : > { %v1328_v30 = vpop.permute.xlu1 %1327 }
 0xcd7   : > { %v1330_v31 = vsel %vm847_vm6, %v1256_v29, %v1328_v30  ;;  %v1515_v29 = vld [vmem:[%s2451_s19 + $0x10] sm:$0xff]  ;;  %v1514_v30 = vld [vmem:[%s2451_s19 + $0x8] sm:$0xff] }
 0xcd8   : > { %1682 = vmatmul.msk.f32.vlgmr.msrb.gmra.mxu0 %vm772_vm1, %v1330_v31  ;;  %1534 = vmatpush.msra.mxu2 %v1515_v29  ;;  %v1513_v31 = vld [vmem:[%s2451_s19] sm:$0xff] }
 0xcda   : > { %1535 = vmatpush.msra.mxu2 %v1514_v30 }
 0xcdc   : > { %1536 = vmatpush.msra.mxu2 %v1513_v31 }
 0xd55   : > { %v1361_v33 = vpop.f32.mrf.mxu0 }
 0xd56   : > { %v1362_v35 = vadd.f32 %v1768_v32, %v1361_v33 }
 0xd58   : > { %v1364_v36 = vadd.f32 %v1362_v35, %v2261_v55 }
 0xd5a   : > { %v1369_v37 = vsel %vm772_vm1, %v1364_v36, 0.0 }
 0xd5b   : > { %1370 = vadd.xlane.f32.xlu0 %v1369_v37 }
 0xdce   : > { %v1371_v38 = vpop.xlane.xlu0 %1370 }
 0xdcf   : > { %v1372_v39 = vmul.f32 %v1371_v38, %v2113_v34 }
 0xdd1   : > { %v1373_v40 = vsub.f32 %v1364_v36, %v1372_v39 }
 0xdd3   : > { %v1374_v41 = vmul.f32 %v1373_v40, %v1373_v40 }
 0xdd5   : > { %v1375_v42 = vsel %vm772_vm1, %v1374_v41, 0.0 }
 0xdd6   : > { %1376 = vadd.xlane.f32.xlu2 %v1375_v42  ;;  %v1773_v42 = vld [vmem:[%s2449_s17 + $0x1] ss:$0 sm:$0xff] }
 0xe49   : > { %v1377_v47 = vpop.xlane.xlu2 %1376 }
 0xe4a   : > { %v1378_v48 = vmul.f32 %v1377_v47, %v2113_v34  ;;  %v1545_v47 = vld [vmem:[%s2453_s21 + $0x18] sm:$0xff] }
 0xe4b   : > { %1562 = vmatpush.msra.mxu0 %v1545_v47 }
 0xe4c   : > { %v1379_v49 = vadd.f32 1e-12, %v1378_v48  ;;  %v1544_v48 = vld [vmem:[%s2453_s21 + $0x10] sm:$0xff] }
 0xe4d   : > { %1563 = vmatpush.msra.mxu0 %v1544_v48 }
 0xe4e   : > { %1801 = vrsqrt.f32 %v1379_v49  ;;  %vm1386_vm0 = vweird.f32 %v1379_v49 }
 0xe54   : > { %v1802_v50 = vpop.eup %1801 }
 0xe55   : > { %v1381_v51 = vmul.f32 %v1802_v50, %v1379_v49  ;;  %vm1387_vm15 = vweird.f32 %v1802_v50  ;;  %v1543_v49 = vld [vmem:[%s2453_s21 + $0x8] sm:$0xff] }
 0xe56   : > { %vm1388_vm2 = vmor %vm1386_vm0, %vm1387_vm15  ;;  %1564 = vmatpush.msra.mxu0 %v1543_v49 }
 0xe57   : > { %v1382_v52 = vmul.f32 %v1802_v50, %v1381_v51  ;;  %v1517_v51 = vld [vmem:[%s2452_s20] sm:$0x1] }
 0xe59   : > { %v1383_v53 = vmul.f32 0.5, %v1382_v52 }
 0xe5b   : > { %v1384_v54 = vsub.f32 1.5, %v1383_v53 }
 0xe5d   : > { %v1385_v55 = vmul.f32 %v1802_v50, %v1384_v54 }
 0xe5f   : > { %v1389_v57 = vsel %vm1388_vm2, %v1802_v50, %v1385_v55  ;;  %v1542_v50 = vld [vmem:[%s2453_s21] sm:$0xff] }
 0xe60   : > { %v1390_v58 = vmul.f32 %v1389_v57, %v1373_v40  ;;  %1565 = vmatpush.msra.mxu0 %v1542_v50  ;;  %v1546_v55 = vld [vmem:[%s2504_s26] sm:$0x1] }
 0xe62   : > { %v1394_v60 = vmul.f32 %v1769_v56, %v1390_v58 }
 0xe64   : > { %v1398_v61 = vadd.f32 %v1770_v59, %v1394_v60 }
 0xe66   : > { %1690 = vmatmul.msk.f32.vlgmr.msrb.gmra.mxu1 %vm772_vm1, %v1398_v61 }
 0xee3   : > { %v1429_v8 = vpop.f32.mrf.mxu1 }
 0xee4   : > { %v1430_v9 = vadd.f32 %v1771_v7, %v1429_v8 }
 0xee6   : > { %v1433_v10 = vmul.f32 0.044715, %v1430_v9  ;;  %v1432_v4 = vmul.f32 0.5, %v1430_v9 }
 0xee8   : > { %v1434_v11 = vmul.f32 %v1433_v10, %v1430_v9 }
 0xeea   : > { %v1435_v12 = vmul.f32 %v1434_v11, %v1430_v9 }
 0xeec   : > { %v1436_v13 = vadd.f32 %v1435_v12, %v1430_v9 }
 0xeee   : > { %v1437_v14 = vmul.f32 0.7978846, %v1436_v13 }
 0xef0   : > { %1803 = vtanh.f32 %v1437_v14 }
 0xef6   : > { %v1804_v15 = vpop.eup %1803 }
 0xef7   : > { %v1439_v16 = vadd.f32 1.0, %v1804_v15 }
 0xef9   : > { %v1440_v17 = vmul.f32 %v1439_v16, %v1432_v4 }
 0xefb   : > { %1700 = vmatmul.msk.f32.vlgmr.msra.gmra.mxu3 %vm1103_vm11, %v1440_v17 }
 0xf7e   : > { %v1475_v19 = vpop.f32.mrf.mxu3 }
 0xf7f   : > { %v1476_v20 = vadd.f32 %v1772_v18, %v1475_v19 }
 0xf81   : > { %v1478_v21 = vadd.f32 %v1476_v20, %v1398_v61 }
 0xf83   : > { %v1483_v22 = vsel %vm772_vm1, %v1478_v21, 0.0 }
 0xf84   : > { %1484 = vadd.xlane.f32.xlu1 %v1483_v22 }
 0xff7   : > { %v1485_v23 = vpop.xlane.xlu1 %1484 }
 0xff8   : > { %v1486_v24 = vmul.f32 %v1485_v23, %v2113_v34 }
 0xffa   : > { %v1487_v25 = vsub.f32 %v1478_v21, %v1486_v24 }
 0xffc   : > { %v1488_v26 = vmul.f32 %v1487_v25, %v1487_v25 }
 0xffe   : > { %v1489_v27 = vsel %vm772_vm1, %v1488_v26, 0.0 }
 0xfff   : > { %1490 = vadd.xlane.f32.xlu0 %v1489_v27 }
0x1072   : > { %v1491_v32 = vpop.xlane.xlu0 %1490 }
0x1073   : > { %v1492_v33 = vmul.f32 %v1491_v32, %v2113_v34  ;;  %v1774_v34 = vld [vmem:[%s2450_s18 + $0x1] ss:$0 sm:$0xff] }
0x1075   : > { %v1493_v35 = vadd.f32 1e-12, %v1492_v33 }
0x1077   : > { %1805 = vrsqrt.f32 %v1493_v35  ;;  %vm1500_vm4 = vweird.f32 %v1493_v35 }
0x107d   : > { %v1806_v36 = vpop.eup %1805 }
0x107e   : > { %v1495_v37 = vmul.f32 %v1806_v36, %v1493_v35  ;;  %vm1501_vm3 = vweird.f32 %v1806_v36 }
0x107f   : > { %vm1502_vm5 = vmor %vm1500_vm4, %vm1501_vm3 }
0x1080   : > { %v1496_v38 = vmul.f32 %v1806_v36, %v1495_v37 }
0x1082   : > { %v1497_v39 = vmul.f32 0.5, %v1496_v38 }
0x1084   : > { %v1498_v40 = vsub.f32 1.5, %v1497_v39 }
0x1086   : > { %v1499_v41 = vmul.f32 %v1806_v36, %v1498_v40 }
0x1088   : > { %v1503_v43 = vsel %vm1502_vm5, %v1806_v36, %v1499_v41 }
0x1089   : > { %v1504_v44 = vmul.f32 %v1503_v43, %v1487_v25 }
0x108b   : > { %v1508_v45 = vmul.f32 %v1773_v42, %v1504_v44 }
0x108d   : > { %v1512_v46 = vadd.f32 %v1774_v34, %v1508_v45 }
0x108f   : > { %1703 = vmatmul.msk.f32.vlgmr.msra.gmra.mxu2 %vm772_vm1, %v1512_v46 }
0x1112   : > { %v1538_v52 = vpop.f32.mrf.mxu2 }
0x1113   : > { %v1539_v53 = vadd.f32 %v1538_v52, %v1517_v51 }
0x1115   : > { %1807 = vtanh.f32 %v1539_v53 }
0x111b   : > { %v1808_v54 = vpop.eup %1807 }
0x111c   : > { %1704 = vmatmul.msk.f32.vlgmr.msra.gmra.mxu0 %vm772_vm1, %v1808_v54 }
0x1199   : > { %v1567_v56 = vpop.f32.mrf.mxu0 }
0x119a   : > { %v1568_v57 = vadd.f32 %v1567_v56, %v1546_v55 }
0x119c   : > { %1570 = vst [vmem:[%s711_s3] sm:$0x1] %v1568_v57 }
0x119d   : > { %1836 = shalt.err (!%p1833_p3)
}
0x119e   : > { %1707 = dma.vmem_to_hbm [thread:$0]  (%p2040_p5), %s1583_s7, 16, %s1585_s28, %s1572_s24  }
0x119f PF: > { %s2505_s27 = sld [smem:[#allocation7_spill]] }
0x11a0   : > { %s2506_s6 = sld [smem:[#allocation5_spill]] }
0x11a5   : > { %p1713_p4 = scmp.ge.s32.totalorder %s2505_s27, 2 }
0x11a6   : > { %s1596_s3 = sand.u32 1, %s2506_s6  }
0x11a7   : > { %p1710_p7 = pnand %p1713_p4, %p2044_p6  ;;  %s1597_s5 = scalar_lea.sflag [#allocation3], %s1596_s3 }
0x11a9   : > { %p1711_p8 = pneg %p1710_p7 }
0x11ab   : > { %1854 = dma.done.wait (%p1711_p8), %s1597_s5, 16  }
0x11ac   : > { %1856 = vsyncadd (%p1711_p8), %s1597_s5, 4294967280  ;;  %s2508_s25 = sld [smem:[#allocation8_spill]]  ;;  %s2511_s4 = smov %s1863_s30 }
0x11ad   : > { %s2509_s8 = sld [smem:[#allocation6_spill]] }
0x11ae   : > { %s2510_s24 = sld [smem:[#allocation9_spill]] }
0x11b2   : > { %p33_p9 = scmp.ge.s32.totalorder %s2508_s25, 4  }
0x11b3   : > { %s2512_s30 = smov %s2509_s8 }
0x11b4   :  { %35 = sbr.rel (!%p33_p9) target bundleno = 14 (0xe), region = 162 }
0x11b9   :  { %1602 = vsyncpa [#allocation3], 1 }
0x11ba   :  { %1604 = vsyncpa [#allocation3 + $0x1], 1 }

</bundles_post_ra>
